<compile_context>
chip_gen: v7x
topology: tpu7x:2x2x1
jax: 0.10.0
libtpu: 0.0.40
codegen_flags: <defaults>
</compile_context>

<pallas_src>
import numpy as np
import jax
import jax.numpy as jnp
from jax.experimental import pallas as pl
from jax.experimental.pallas import tpu as pltpu

# ----------------------------- hyperparameters ------------------------------
BATCH = 2
SEQ = 8
INPUT_SIZE = 8
HIDDEN = 32
NUM_LAYERS = 2
N_HEADS = 4
HEAD_DIM = HIDDEN // N_HEADS
FFN = HIDDEN * 4
HALF = HIDDEN // 2
OUTPUT_SIZE = 4
LN_EPS = 1e-5
BN_EPS = 1e-5
ROWS = BATCH * SEQ
NEG_INF = -1e30


# --------------------------------- kernel -----------------------------------
def transformer_kernel(x_ref, pebp_ref, sel_ref, mfull_ref, msel_ref,
                       wp_ref, wq_ref, wkv_ref, wo_ref, w1_ref, w2_ref,
                       bvec_ref, fc1w_ref, fc1b_ref, fc2w_ref, fc2b_ref,
                       out_ref):
    f32 = jnp.float32

    def layernorm(t, w, b):
        m = jnp.mean(t, axis=-1, keepdims=True)
        v = jnp.mean(jnp.square(t - m), axis=-1, keepdims=True)
        return (t - m) * jax.lax.rsqrt(v + LN_EPS) * w + b

    def encoder_layer(h_q, h_kv, amask, l):
        # per-layer bias / layernorm vectors, one lane-dense slab load
        bl = bvec_ref[l]                              # (16, 128)
        bq = bl[0:1, :HIDDEN]
        bkv = bl[1:2, :2 * HIDDEN]
        bo = bl[2:3, :HIDDEN]
        ln1w, ln1b = bl[3:4, :HIDDEN], bl[4:5, :HIDDEN]
        b1 = bl[5:6, :FFN]
        b2 = bl[6:7, :HIDDEN]
        ln2w, ln2b = bl[7:8, :HIDDEN], bl[8:9, :HIDDEN]

        # fused projections; 1/sqrt(HEAD_DIM) is pre-folded into wq/bq
        q = jnp.dot(h_q, wq_ref[l], preferred_element_type=f32) + bq     # (Mq, 32)
        kv = jnp.dot(h_kv, wkv_ref[l], preferred_element_type=f32) + bkv  # (Mkv, 64)

        heads = []
        for hh in range(N_HEADS):                    # static per-head lane slices
            lo = hh * HEAD_DIM
            qh = q[:, lo:lo + HEAD_DIM]
            kh = kv[:, lo:lo + HEAD_DIM]
            vh = kv[:, HIDDEN + lo:HIDDEN + lo + HEAD_DIM]
            s = jax.lax.dot_general(qh, kh, (((1,), (1,)), ((), ())),
                                    preferred_element_type=f32)          # (Mq, Mkv)
            s = s + amask
            s = s - jnp.max(s, axis=-1, keepdims=True)
            p = jnp.exp(s)
            p = p * pl.reciprocal(jnp.sum(p, axis=-1, keepdims=True), approx=True)
            heads.append(jnp.dot(p, vh, preferred_element_type=f32))     # (Mq, 8)

        # single output projection on concatenated head outputs
        a = jnp.concatenate(heads, axis=-1)                              # (Mq, 32)
        a = jnp.dot(a, wo_ref[l], preferred_element_type=f32) + bo

        h = layernorm(h_q + a, ln1w, ln1b)                               # post-norm
        ff = jnp.dot(h, w1_ref[l], preferred_element_type=f32) + b1
        ff = jnp.maximum(ff, 0.0)
        ff = jnp.dot(ff, w2_ref[l], preferred_element_type=f32) + b2
        return layernorm(h + ff, ln2w, ln2b)

    # input projection + positional encoding (bp folded into pebp); dropout = id
    h = jnp.dot(x_ref[...], wp_ref[...], preferred_element_type=f32) + pebp_ref[...]

    mask_full = mfull_ref[...]                                           # (ROWS, ROWS)
    for l in range(NUM_LAYERS - 1):                                      # full-row layers
        h = encoder_layer(h, h, mask_full, l)

    # last encoder layer: only the last token of each batch item feeds the head,
    # so restrict Q / residual / LN / FFN to those BATCH rows (K/V use all rows).
    h_sel = jnp.dot(sel_ref[...], h, preferred_element_type=f32)         # (BATCH, 32)
    h_last = encoder_layer(h_sel, h, msel_ref[...], NUM_LAYERS - 1)      # (BATCH, 32)

    # bn1/bn2 (eval) folded into fc1; dropout = id
    z = jnp.dot(h_last, fc1w_ref[...], preferred_element_type=f32) + fc1b_ref[...]
    z = jnp.maximum(z, 0.0)
    z = jnp.dot(z, fc2w_ref[...], preferred_element_type=f32) + fc2b_ref[...]
    out_ref[...] = jax.nn.sigmoid(z)                                     # single store


# --------------------- one-time (host) parameter preparation -----------------
def prepare_kernel_params(params):
    (pe, wp, bp, wq, bq, wk, bk, wv, bv, wo, bo,
     ln1w, ln1b, w1, b1, w2, b2, ln2w, ln2b,
     bn1, fc1w, fc1b, bn2, fc2w, fc2b) = [np.asarray(p, np.float32) for p in params]

    scale = float(1.0 / np.sqrt(HEAD_DIM))

    # positional encoding tiled per batch, with the input-projection bias folded in
    pe_bp = np.tile(pe, (BATCH, 1)) + bp[None, :]

    # last-token selection matrix
    sel = np.zeros((BATCH, ROWS), np.float32)
    for b in range(BATCH):
        sel[b, b * SEQ + SEQ - 1] = 1.0

    # block-diagonal additive batch masks (precomputed constants)
    rows = np.arange(ROWS) // SEQ
    mask_full = np.where(rows[:, None] == rows[None, :], 0.0, NEG_INF).astype(np.float32)
    mask_sel = np.where(np.arange(BATCH)[:, None] == rows[None, :],
                        0.0, NEG_INF).astype(np.float32)

    # attention scale folded into Wq/bq; K/V packed along lanes
    wq_s = (wq * scale).astype(np.float32)                       # (L, 32, 32)
    wkv = np.concatenate([wk, wv], axis=-1).astype(np.float32)   # (L, 32, 64)

    # all per-layer bias / layernorm vectors in one lane-dense slab
    bvec = np.zeros((NUM_LAYERS, 16, 128), np.float32)
    bvec[:, 0, :HIDDEN] = bq * scale
    bvec[:, 1, :2 * HIDDEN] = np.concatenate([bk, bv], axis=-1)
    bvec[:, 2, :HIDDEN] = bo
    bvec[:, 3, :HIDDEN] = ln1w
    bvec[:, 4, :HIDDEN] = ln1b
    bvec[:, 5, :FFN] = b1
    bvec[:, 6, :HIDDEN] = b2
    bvec[:, 7, :HIDDEN] = ln2w
    bvec[:, 8, :HIDDEN] = ln2b

    # fold eval-mode BatchNorms into fc1
    g1, be1, m1, v1 = bn1
    g2, be2, m2, v2 = bn2
    s1 = g1 / np.sqrt(v1 + BN_EPS)
    t1 = be1 - m1 * s1
    s2 = g2 / np.sqrt(v2 + BN_EPS)
    t2 = be2 - m2 * s2
    fc1w_f = (s1[:, None] * fc1w) * s2[None, :]
    fc1b_f = ((t1 @ fc1w + fc1b) * s2 + t2)[None, :]

    kp = (pe_bp, sel, mask_full, mask_sel, wp, wq_s, wkv, wo, w1, w2, bvec,
          fc1w_f, fc1b_f, fc2w, fc2b[None, :])
    return tuple(jnp.asarray(a, dtype=jnp.float32) for a in kp)


# -------------------------------- wrapper ------------------------------------
@jax.jit
def transformer_forward(x, kparams):
    x2d = x.reshape(ROWS, INPUT_SIZE)               # batch folded into matmul rows
    vmem_spec = pl.BlockSpec(memory_space=pltpu.MemorySpace.VMEM)
    n_in = 1 + len(kparams)
    return pl.pallas_call(
        transformer_kernel,
        out_shape=jax.ShapeDtypeStruct((BATCH, OUTPUT_SIZE), jnp.float32),
        in_specs=[vmem_spec] * n_in,
        out_specs=vmem_spec,
    )(x2d, *kparams)


# --------------------------- deterministic params ----------------------------
def init_params(key):
    ks = iter(jax.random.split(key, 64))

    def rnd(shape, scale=0.1):
        return (scale * jax.random.normal(next(ks), shape)).astype(jnp.float32)

    # PositionalEncoding buffer (first SEQ rows)
    position = np.arange(SEQ, dtype=np.float32)[:, None]
    div_term = np.exp(np.arange(0, HIDDEN, 2, dtype=np.float32)
                      * (-np.log(10000.0) / HIDDEN))
    pe_np = np.zeros((SEQ, HIDDEN), dtype=np.float32)
    pe_np[:, 0::2] = np.sin(position * div_term)
    pe_np[:, 1::2] = np.cos(position * div_term)
    pe = jnp.asarray(pe_np)

    wp = rnd((INPUT_SIZE, HIDDEN)); bp = rnd((HIDDEN,))
    wq = rnd((NUM_LAYERS, HIDDEN, HIDDEN)); bq = rnd((NUM_LAYERS, HIDDEN))
    wk = rnd((NUM_LAYERS, HIDDEN, HIDDEN)); bk = rnd((NUM_LAYERS, HIDDEN))
    wv = rnd((NUM_LAYERS, HIDDEN, HIDDEN)); bv = rnd((NUM_LAYERS, HIDDEN))
    wo = rnd((NUM_LAYERS, HIDDEN, HIDDEN)); bo = rnd((NUM_LAYERS, HIDDEN))
    ln1w = 1.0 + rnd((NUM_LAYERS, HIDDEN), 0.01); ln1b = rnd((NUM_LAYERS, HIDDEN), 0.01)
    w1 = rnd((NUM_LAYERS, HIDDEN, FFN)); b1 = rnd((NUM_LAYERS, FFN))
    w2 = rnd((NUM_LAYERS, FFN, HIDDEN)); b2 = rnd((NUM_LAYERS, HIDDEN))
    ln2w = 1.0 + rnd((NUM_LAYERS, HIDDEN), 0.01); ln2b = rnd((NUM_LAYERS, HIDDEN), 0.01)

    # BatchNorm (eval mode); rows = [gamma, beta, running_mean, running_var]
    bn1 = jnp.stack([jnp.ones(HIDDEN, jnp.float32), rnd((HIDDEN,), 0.05),
                     rnd((HIDDEN,), 0.05),
                     jnp.ones(HIDDEN, jnp.float32) + jnp.abs(rnd((HIDDEN,), 0.05))])
    fc1w = rnd((HIDDEN, HALF)); fc1b = rnd((HALF,))
    bn2 = jnp.stack([jnp.ones(HALF, jnp.float32), rnd((HALF,), 0.05),
                     rnd((HALF,), 0.05),
                     jnp.ones(HALF, jnp.float32) + jnp.abs(rnd((HALF,), 0.05))])
    fc2w = rnd((HALF, OUTPUT_SIZE)); fc2b = rnd((OUTPUT_SIZE,))

    return (pe, wp, bp, wq, bq, wk, bk, wv, bv, wo, bo,
            ln1w, ln1b, w1, b1, w2, b2, ln2w, ln2b,
            bn1, fc1w, fc1b, bn2, fc2w, fc2b)


# --------------------------- pure-JAX reference ------------------------------
def reference_forward(x, params):
    (pe, wp, bp, wq, bq, wk, bk, wv, bv, wo, bo,
     ln1w, ln1b, w1, b1, w2, b2, ln2w, ln2b,
     bn1, fc1w, fc1b, bn2, fc2w, fc2b) = params

    def ln(t, w, b_):
        m = t.mean(-1, keepdims=True)
        v = ((t - m) ** 2).mean(-1, keepdims=True)
        return (t - m) / jnp.sqrt(v + LN_EPS) * w + b_

    h = x @ wp + bp
    h = h + pe[None]
    for l in range(NUM_LAYERS):
        q = h @ wq[l] + bq[l]
        k = h @ wk[l] + bk[l]
        v = h @ wv[l] + bv[l]

        def split_heads(t):
            return t.reshape(BATCH, SEQ, N_HEADS, HEAD_DIM).transpose(0, 2, 1, 3)

        qh, kh, vh = split_heads(q), split_heads(k), split_heads(v)
        s = jnp.einsum('bhqd,bhkd->bhqk', qh, kh) / np.sqrt(HEAD_DIM)
        p = jax.nn.softmax(s, axis=-1)
        a = jnp.einsum('bhqk,bhkd->bhqd', p, vh)
        a = a.transpose(0, 2, 1, 3).reshape(BATCH, SEQ, HIDDEN)
        a = a @ wo[l] + bo[l]
        h = ln(h + a, ln1w[l], ln1b[l])
        ff = jax.nn.relu(h @ w1[l] + b1[l]) @ w2[l] + b2[l]
        h = ln(h + ff, ln2w[l], ln2b[l])

    last = h[:, -1, :]
    z = (last - bn1[2]) / jnp.sqrt(bn1[3] + BN_EPS) * bn1[0] + bn1[1]
    z = z @ fc1w + fc1b
    z = (z - bn2[2]) / jnp.sqrt(bn2[3] + BN_EPS) * bn2[0] + bn2[1]
    z = jax.nn.relu(z)
    z = z @ fc2w + fc2b
    return jax.nn.sigmoid(z)


# ----------------------------------- main ------------------------------------
if __name__ == "__main__":
    key = jax.random.PRNGKey(0)
    kx, kp = jax.random.split(key)
    x = jax.random.normal(kx, (BATCH, SEQ, INPUT_SIZE), dtype=jnp.float32)
    params = init_params(kp)

    # one-time host-side parameter preparation (hoisted out of the jitted path)
    kparams = prepare_kernel_params(params)

    out = transformer_forward(x, kparams)
    out = jax.block_until_ready(out)

    ref = reference_forward(x, params)
    np.testing.assert_allclose(np.asarray(out), np.asarray(ref),
                               rtol=2e-3, atol=2e-3)
    print("KERNEL_OK")
</pallas_src>

<mosaic_0001>
module attributes {stable_mosaic.version = 11 : i64} {
  func.func @transformer_kernel(%arg0: memref<16x8xf32, #tpu.memory_space<vmem>>, %arg1: memref<16x32xf32, #tpu.memory_space<vmem>>, %arg2: memref<2x16xf32, #tpu.memory_space<vmem>>, %arg3: memref<16x16xf32, #tpu.memory_space<vmem>>, %arg4: memref<2x16xf32, #tpu.memory_space<vmem>>, %arg5: memref<8x32xf32, #tpu.memory_space<vmem>>, %arg6: memref<2x32x32xf32, #tpu.memory_space<vmem>>, %arg7: memref<2x32x64xf32, #tpu.memory_space<vmem>>, %arg8: memref<2x32x32xf32, #tpu.memory_space<vmem>>, %arg9: memref<2x32x128xf32, #tpu.memory_space<vmem>>, %arg10: memref<2x128x32xf32, #tpu.memory_space<vmem>>, %arg11: memref<2x16x128xf32, #tpu.memory_space<vmem>>, %arg12: memref<32x16xf32, #tpu.memory_space<vmem>>, %arg13: memref<1x16xf32, #tpu.memory_space<vmem>>, %arg14: memref<16x4xf32, #tpu.memory_space<vmem>>, %arg15: memref<1x4xf32, #tpu.memory_space<vmem>>, %arg16: memref<2x4xf32, #tpu.memory_space<vmem>>) attributes {dimension_semantics = [], scalar_prefetch = 0 : i64, scratch_operands = 0 : i64, tpu.core_type = #tpu.core_type<tc>} {
    %c0 = arith.constant 0 : index
    %c0_0 = arith.constant 0 : index
    %0 = vector.load %arg0[%c0, %c0_0] : memref<16x8xf32, #tpu.memory_space<vmem>>, vector<16x8xf32>
    %c0_1 = arith.constant 0 : index
    %c0_2 = arith.constant 0 : index
    %1 = vector.load %arg5[%c0_1, %c0_2] : memref<8x32xf32, #tpu.memory_space<vmem>>, vector<8x32xf32>
    %cst = arith.constant dense<0.000000e+00> : vector<16x32xf32>
    %2 = tpu.matmul %0, %1, %cst {dimension_numbers = #tpu.dot_dimension_numbers<[1], [0], [0], [1], [0, 0, 1, 1], [], []>} : vector<16x8xf32>, vector<8x32xf32>, vector<16x32xf32> -> vector<16x32xf32>
    %c0_3 = arith.constant 0 : index
    %c0_4 = arith.constant 0 : index
    %3 = vector.load %arg1[%c0_3, %c0_4] : memref<16x32xf32, #tpu.memory_space<vmem>>, vector<16x32xf32>
    %4 = arith.addf %2, %3 : vector<16x32xf32>
    %c0_5 = arith.constant 0 : index
    %c0_6 = arith.constant 0 : index
    %5 = vector.load %arg3[%c0_5, %c0_6] : memref<16x16xf32, #tpu.memory_space<vmem>>, vector<16x16xf32>
    %c0_7 = arith.constant 0 : index
    %c0_8 = arith.constant 0 : index
    %c0_9 = arith.constant 0 : index
    %6 = vector.load %arg11[%c0_7, %c0_8, %c0_9] : memref<2x16x128xf32, #tpu.memory_space<vmem>>, vector<1x16x128xf32>
    %7 = vector.shape_cast %6 : vector<1x16x128xf32> to vector<16x128xf32>
    %8 = vector.extract_strided_slice %7 {offsets = [0, 0], sizes = [1, 32], strides = [1, 1]} : vector<16x128xf32> to vector<1x32xf32>
    %9 = vector.extract_strided_slice %7 {offsets = [1, 0], sizes = [1, 64], strides = [1, 1]} : vector<16x128xf32> to vector<1x64xf32>
    %10 = vector.extract_strided_slice %7 {offsets = [2, 0], sizes = [1, 32], strides = [1, 1]} : vector<16x128xf32> to vector<1x32xf32>
    %11 = vector.extract_strided_slice %7 {offsets = [3, 0], sizes = [1, 32], strides = [1, 1]} : vector<16x128xf32> to vector<1x32xf32>
    %12 = vector.extract_strided_slice %7 {offsets = [4, 0], sizes = [1, 32], strides = [1, 1]} : vector<16x128xf32> to vector<1x32xf32>
    %13 = vector.extract_strided_slice %7 {offsets = [5, 0], sizes = [1, 128], strides = [1, 1]} : vector<16x128xf32> to vector<1x128xf32>
    %14 = vector.extract_strided_slice %7 {offsets = [6, 0], sizes = [1, 32], strides = [1, 1]} : vector<16x128xf32> to vector<1x32xf32>
    %15 = vector.extract_strided_slice %7 {offsets = [7, 0], sizes = [1, 32], strides = [1, 1]} : vector<16x128xf32> to vector<1x32xf32>
    %16 = vector.extract_strided_slice %7 {offsets = [8, 0], sizes = [1, 32], strides = [1, 1]} : vector<16x128xf32> to vector<1x32xf32>
    %c0_10 = arith.constant 0 : index
    %c0_11 = arith.constant 0 : index
    %c0_12 = arith.constant 0 : index
    %17 = vector.load %arg6[%c0_10, %c0_11, %c0_12] : memref<2x32x32xf32, #tpu.memory_space<vmem>>, vector<1x32x32xf32>
    %18 = vector.shape_cast %17 : vector<1x32x32xf32> to vector<32x32xf32>
    %cst_13 = arith.constant dense<0.000000e+00> : vector<16x32xf32>
    %19 = tpu.matmul %4, %18, %cst_13 {dimension_numbers = #tpu.dot_dimension_numbers<[1], [0], [0], [1], [0, 0, 1, 1], [], []>} : vector<16x32xf32>, vector<32x32xf32>, vector<16x32xf32> -> vector<16x32xf32>
    %20 = vector.broadcast %8 : vector<1x32xf32> to vector<16x32xf32>
    %21 = arith.addf %19, %20 : vector<16x32xf32>
    %c0_14 = arith.constant 0 : index
    %c0_15 = arith.constant 0 : index
    %c0_16 = arith.constant 0 : index
    %22 = vector.load %arg7[%c0_14, %c0_15, %c0_16] : memref<2x32x64xf32, #tpu.memory_space<vmem>>, vector<1x32x64xf32>
    %23 = vector.shape_cast %22 : vector<1x32x64xf32> to vector<32x64xf32>
    %cst_17 = arith.constant dense<0.000000e+00> : vector<16x64xf32>
    %24 = tpu.matmul %4, %23, %cst_17 {dimension_numbers = #tpu.dot_dimension_numbers<[1], [0], [0], [1], [0, 0, 1, 1], [], []>} : vector<16x32xf32>, vector<32x64xf32>, vector<16x64xf32> -> vector<16x64xf32>
    %25 = vector.broadcast %9 : vector<1x64xf32> to vector<16x64xf32>
    %26 = arith.addf %24, %25 : vector<16x64xf32>
    %27 = vector.extract_strided_slice %21 {offsets = [0, 0], sizes = [16, 8], strides = [1, 1]} : vector<16x32xf32> to vector<16x8xf32>
    %28 = vector.extract_strided_slice %26 {offsets = [0, 0], sizes = [16, 8], strides = [1, 1]} : vector<16x64xf32> to vector<16x8xf32>
    %29 = vector.extract_strided_slice %26 {offsets = [0, 32], sizes = [16, 8], strides = [1, 1]} : vector<16x64xf32> to vector<16x8xf32>
    %cst_18 = arith.constant dense<0.000000e+00> : vector<16x16xf32>
    %30 = tpu.matmul %27, %28, %cst_18 {dimension_numbers = #tpu.dot_dimension_numbers<[1], [1], [0], [0], [0, 0, 1, 0], [], []>} : vector<16x8xf32>, vector<16x8xf32>, vector<16x16xf32> -> vector<16x16xf32>
    %31 = arith.addf %30, %5 : vector<16x16xf32>
    %cst_19 = arith.constant dense<0xFF800000> : vector<16xf32>
    %32 = vector.multi_reduction <maximumf>, %31, %cst_19 [1] : vector<16x16xf32> to vector<16xf32>
    %33 = vector.shape_cast %32 : vector<16xf32> to vector<16x1xf32>
    %34 = vector.broadcast %33 : vector<16x1xf32> to vector<16x16xf32>
    %35 = arith.subf %31, %34 : vector<16x16xf32>
    %36 = math.exp %35 : vector<16x16xf32>
    %cst_20 = arith.constant dense<0.000000e+00> : vector<16xf32>
    %37 = vector.multi_reduction <add>, %36, %cst_20 [1] : vector<16x16xf32> to vector<16xf32>
    %38 = vector.shape_cast %37 : vector<16xf32> to vector<16x1xf32>
    %39 = tpu.reciprocal %38 {approx = true} : vector<16x1xf32> -> vector<16x1xf32>
    %40 = vector.broadcast %39 : vector<16x1xf32> to vector<16x16xf32>
    %41 = arith.mulf %36, %40 : vector<16x16xf32>
    %cst_21 = arith.constant dense<0.000000e+00> : vector<16x8xf32>
    %42 = tpu.matmul %41, %29, %cst_21 {dimension_numbers = #tpu.dot_dimension_numbers<[1], [0], [0], [1], [0, 0, 1, 1], [], []>} : vector<16x16xf32>, vector<16x8xf32>, vector<16x8xf32> -> vector<16x8xf32>
    %43 = vector.extract_strided_slice %21 {offsets = [0, 8], sizes = [16, 8], strides = [1, 1]} : vector<16x32xf32> to vector<16x8xf32>
    %44 = vector.extract_strided_slice %26 {offsets = [0, 8], sizes = [16, 8], strides = [1, 1]} : vector<16x64xf32> to vector<16x8xf32>
    %45 = vector.extract_strided_slice %26 {offsets = [0, 40], sizes = [16, 8], strides = [1, 1]} : vector<16x64xf32> to vector<16x8xf32>
    %cst_22 = arith.constant dense<0.000000e+00> : vector<16x16xf32>
    %46 = tpu.matmul %43, %44, %cst_22 {dimension_numbers = #tpu.dot_dimension_numbers<[1], [1], [0], [0], [0, 0, 1, 0], [], []>} : vector<16x8xf32>, vector<16x8xf32>, vector<16x16xf32> -> vector<16x16xf32>
    %47 = arith.addf %46, %5 : vector<16x16xf32>
    %cst_23 = arith.constant dense<0xFF800000> : vector<16xf32>
    %48 = vector.multi_reduction <maximumf>, %47, %cst_23 [1] : vector<16x16xf32> to vector<16xf32>
    %49 = vector.shape_cast %48 : vector<16xf32> to vector<16x1xf32>
    %50 = vector.broadcast %49 : vector<16x1xf32> to vector<16x16xf32>
    %51 = arith.subf %47, %50 : vector<16x16xf32>
    %52 = math.exp %51 : vector<16x16xf32>
    %cst_24 = arith.constant dense<0.000000e+00> : vector<16xf32>
    %53 = vector.multi_reduction <add>, %52, %cst_24 [1] : vector<16x16xf32> to vector<16xf32>
    %54 = vector.shape_cast %53 : vector<16xf32> to vector<16x1xf32>
    %55 = tpu.reciprocal %54 {approx = true} : vector<16x1xf32> -> vector<16x1xf32>
    %56 = vector.broadcast %55 : vector<16x1xf32> to vector<16x16xf32>
    %57 = arith.mulf %52, %56 : vector<16x16xf32>
    %cst_25 = arith.constant dense<0.000000e+00> : vector<16x8xf32>
    %58 = tpu.matmul %57, %45, %cst_25 {dimension_numbers = #tpu.dot_dimension_numbers<[1], [0], [0], [1], [0, 0, 1, 1], [], []>} : vector<16x16xf32>, vector<16x8xf32>, vector<16x8xf32> -> vector<16x8xf32>
    %59 = vector.extract_strided_slice %21 {offsets = [0, 16], sizes = [16, 8], strides = [1, 1]} : vector<16x32xf32> to vector<16x8xf32>
    %60 = vector.extract_strided_slice %26 {offsets = [0, 16], sizes = [16, 8], strides = [1, 1]} : vector<16x64xf32> to vector<16x8xf32>
    %61 = vector.extract_strided_slice %26 {offsets = [0, 48], sizes = [16, 8], strides = [1, 1]} : vector<16x64xf32> to vector<16x8xf32>
    %cst_26 = arith.constant dense<0.000000e+00> : vector<16x16xf32>
    %62 = tpu.matmul %59, %60, %cst_26 {dimension_numbers = #tpu.dot_dimension_numbers<[1], [1], [0], [0], [0, 0, 1, 0], [], []>} : vector<16x8xf32>, vector<16x8xf32>, vector<16x16xf32> -> vector<16x16xf32>
    %63 = arith.addf %62, %5 : vector<16x16xf32>
    %cst_27 = arith.constant dense<0xFF800000> : vector<16xf32>
    %64 = vector.multi_reduction <maximumf>, %63, %cst_27 [1] : vector<16x16xf32> to vector<16xf32>
    %65 = vector.shape_cast %64 : vector<16xf32> to vector<16x1xf32>
    %66 = vector.broadcast %65 : vector<16x1xf32> to vector<16x16xf32>
    %67 = arith.subf %63, %66 : vector<16x16xf32>
    %68 = math.exp %67 : vector<16x16xf32>
    %cst_28 = arith.constant dense<0.000000e+00> : vector<16xf32>
    %69 = vector.multi_reduction <add>, %68, %cst_28 [1] : vector<16x16xf32> to vector<16xf32>
    %70 = vector.shape_cast %69 : vector<16xf32> to vector<16x1xf32>
    %71 = tpu.reciprocal %70 {approx = true} : vector<16x1xf32> -> vector<16x1xf32>
    %72 = vector.broadcast %71 : vector<16x1xf32> to vector<16x16xf32>
    %73 = arith.mulf %68, %72 : vector<16x16xf32>
    %cst_29 = arith.constant dense<0.000000e+00> : vector<16x8xf32>
    %74 = tpu.matmul %73, %61, %cst_29 {dimension_numbers = #tpu.dot_dimension_numbers<[1], [0], [0], [1], [0, 0, 1, 1], [], []>} : vector<16x16xf32>, vector<16x8xf32>, vector<16x8xf32> -> vector<16x8xf32>
    %75 = vector.extract_strided_slice %21 {offsets = [0, 24], sizes = [16, 8], strides = [1, 1]} : vector<16x32xf32> to vector<16x8xf32>
    %76 = vector.extract_strided_slice %26 {offsets = [0, 24], sizes = [16, 8], strides = [1, 1]} : vector<16x64xf32> to vector<16x8xf32>
    %77 = vector.extract_strided_slice %26 {offsets = [0, 56], sizes = [16, 8], strides = [1, 1]} : vector<16x64xf32> to vector<16x8xf32>
    %cst_30 = arith.constant dense<0.000000e+00> : vector<16x16xf32>
    %78 = tpu.matmul %75, %76, %cst_30 {dimension_numbers = #tpu.dot_dimension_numbers<[1], [1], [0], [0], [0, 0, 1, 0], [], []>} : vector<16x8xf32>, vector<16x8xf32>, vector<16x16xf32> -> vector<16x16xf32>
    %79 = arith.addf %78, %5 : vector<16x16xf32>
    %cst_31 = arith.constant dense<0xFF800000> : vector<16xf32>
    %80 = vector.multi_reduction <maximumf>, %79, %cst_31 [1] : vector<16x16xf32> to vector<16xf32>
    %81 = vector.shape_cast %80 : vector<16xf32> to vector<16x1xf32>
    %82 = vector.broadcast %81 : vector<16x1xf32> to vector<16x16xf32>
    %83 = arith.subf %79, %82 : vector<16x16xf32>
    %84 = math.exp %83 : vector<16x16xf32>
    %cst_32 = arith.constant dense<0.000000e+00> : vector<16xf32>
    %85 = vector.multi_reduction <add>, %84, %cst_32 [1] : vector<16x16xf32> to vector<16xf32>
    %86 = vector.shape_cast %85 : vector<16xf32> to vector<16x1xf32>
    %87 = tpu.reciprocal %86 {approx = true} : vector<16x1xf32> -> vector<16x1xf32>
    %88 = vector.broadcast %87 : vector<16x1xf32> to vector<16x16xf32>
    %89 = arith.mulf %84, %88 : vector<16x16xf32>
    %cst_33 = arith.constant dense<0.000000e+00> : vector<16x8xf32>
    %90 = tpu.matmul %89, %77, %cst_33 {dimension_numbers = #tpu.dot_dimension_numbers<[1], [0], [0], [1], [0, 0, 1, 1], [], []>} : vector<16x16xf32>, vector<16x8xf32>, vector<16x8xf32> -> vector<16x8xf32>
    %91 = tpu.concatenate %42, %58, %74, %90 in 1 : vector<16x8xf32>, vector<16x8xf32>, vector<16x8xf32>, vector<16x8xf32> -> vector<16x32xf32>
    %c0_34 = arith.constant 0 : index
    %c0_35 = arith.constant 0 : index
    %c0_36 = arith.constant 0 : index
    %92 = vector.load %arg8[%c0_34, %c0_35, %c0_36] : memref<2x32x32xf32, #tpu.memory_space<vmem>>, vector<1x32x32xf32>
    %93 = vector.shape_cast %92 : vector<1x32x32xf32> to vector<32x32xf32>
    %cst_37 = arith.constant dense<0.000000e+00> : vector<16x32xf32>
    %94 = tpu.matmul %91, %93, %cst_37 {dimension_numbers = #tpu.dot_dimension_numbers<[1], [0], [0], [1], [0, 0, 1, 1], [], []>} : vector<16x32xf32>, vector<32x32xf32>, vector<16x32xf32> -> vector<16x32xf32>
    %95 = vector.broadcast %10 : vector<1x32xf32> to vector<16x32xf32>
    %96 = arith.addf %94, %95 : vector<16x32xf32>
    %97 = arith.addf %4, %96 : vector<16x32xf32>
    %cst_38 = arith.constant dense<0.000000e+00> : vector<16xf32>
    %98 = vector.multi_reduction <add>, %97, %cst_38 [1] : vector<16x32xf32> to vector<16xf32>
    %99 = vector.shape_cast %98 : vector<16xf32> to vector<16x1xf32>
    %cst_39 = arith.constant 3.200000e+01 : f32
    %100 = vector.broadcast %cst_39 : f32 to vector<16x1xf32>
    %101 = arith.divf %99, %100 : vector<16x1xf32>
    %102 = vector.broadcast %101 : vector<16x1xf32> to vector<16x32xf32>
    %103 = arith.subf %97, %102 : vector<16x32xf32>
    %104 = arith.mulf %103, %103 : vector<16x32xf32>
    %cst_40 = arith.constant dense<0.000000e+00> : vector<16xf32>
    %105 = vector.multi_reduction <add>, %104, %cst_40 [1] : vector<16x32xf32> to vector<16xf32>
    %106 = vector.shape_cast %105 : vector<16xf32> to vector<16x1xf32>
    %cst_41 = arith.constant 3.200000e+01 : f32
    %107 = vector.broadcast %cst_41 : f32 to vector<16x1xf32>
    %108 = arith.divf %106, %107 : vector<16x1xf32>
    %109 = vector.broadcast %101 : vector<16x1xf32> to vector<16x32xf32>
    %110 = arith.subf %97, %109 : vector<16x32xf32>
    %cst_42 = arith.constant 9.99999974E-6 : f32
    %111 = vector.broadcast %cst_42 : f32 to vector<16x1xf32>
    %112 = arith.addf %108, %111 : vector<16x1xf32>
    %113 = math.rsqrt %112 : vector<16x1xf32>
    %114 = vector.broadcast %113 : vector<16x1xf32> to vector<16x32xf32>
    %115 = arith.mulf %110, %114 : vector<16x32xf32>
    %116 = vector.broadcast %11 : vector<1x32xf32> to vector<16x32xf32>
    %117 = arith.mulf %115, %116 : vector<16x32xf32>
    %118 = vector.broadcast %12 : vector<1x32xf32> to vector<16x32xf32>
    %119 = arith.addf %117, %118 : vector<16x32xf32>
    %c0_43 = arith.constant 0 : index
    %c0_44 = arith.constant 0 : index
    %c0_45 = arith.constant 0 : index
    %120 = vector.load %arg9[%c0_43, %c0_44, %c0_45] : memref<2x32x128xf32, #tpu.memory_space<vmem>>, vector<1x32x128xf32>
    %121 = vector.shape_cast %120 : vector<1x32x128xf32> to vector<32x128xf32>
    %cst_46 = arith.constant dense<0.000000e+00> : vector<16x128xf32>
    %122 = tpu.matmul %119, %121, %cst_46 {dimension_numbers = #tpu.dot_dimension_numbers<[1], [0], [0], [1], [0, 0, 1, 1], [], []>} : vector<16x32xf32>, vector<32x128xf32>, vector<16x128xf32> -> vector<16x128xf32>
    %123 = vector.broadcast %13 : vector<1x128xf32> to vector<16x128xf32>
    %124 = arith.addf %122, %123 : vector<16x128xf32>
    %cst_47 = arith.constant 0.000000e+00 : f32
    %125 = vector.broadcast %cst_47 : f32 to vector<16x128xf32>
    %126 = arith.maximumf %124, %125 : vector<16x128xf32>
    %c0_48 = arith.constant 0 : index
    %c0_49 = arith.constant 0 : index
    %c0_50 = arith.constant 0 : index
    %127 = vector.load %arg10[%c0_48, %c0_49, %c0_50] : memref<2x128x32xf32, #tpu.memory_space<vmem>>, vector<1x128x32xf32>
    %128 = vector.shape_cast %127 : vector<1x128x32xf32> to vector<128x32xf32>
    %cst_51 = arith.constant dense<0.000000e+00> : vector<16x32xf32>
    %129 = tpu.matmul %126, %128, %cst_51 {dimension_numbers = #tpu.dot_dimension_numbers<[1], [0], [0], [1], [0, 0, 1, 1], [], []>} : vector<16x128xf32>, vector<128x32xf32>, vector<16x32xf32> -> vector<16x32xf32>
    %130 = vector.broadcast %14 : vector<1x32xf32> to vector<16x32xf32>
    %131 = arith.addf %129, %130 : vector<16x32xf32>
    %132 = arith.addf %119, %131 : vector<16x32xf32>
    %cst_52 = arith.constant dense<0.000000e+00> : vector<16xf32>
    %133 = vector.multi_reduction <add>, %132, %cst_52 [1] : vector<16x32xf32> to vector<16xf32>
    %134 = vector.shape_cast %133 : vector<16xf32> to vector<16x1xf32>
    %cst_53 = arith.constant 3.200000e+01 : f32
    %135 = vector.broadcast %cst_53 : f32 to vector<16x1xf32>
    %136 = arith.divf %134, %135 : vector<16x1xf32>
    %137 = vector.broadcast %136 : vector<16x1xf32> to vector<16x32xf32>
    %138 = arith.subf %132, %137 : vector<16x32xf32>
    %139 = arith.mulf %138, %138 : vector<16x32xf32>
    %cst_54 = arith.constant dense<0.000000e+00> : vector<16xf32>
    %140 = vector.multi_reduction <add>, %139, %cst_54 [1] : vector<16x32xf32> to vector<16xf32>
    %141 = vector.shape_cast %140 : vector<16xf32> to vector<16x1xf32>
    %cst_55 = arith.constant 3.200000e+01 : f32
    %142 = vector.broadcast %cst_55 : f32 to vector<16x1xf32>
    %143 = arith.divf %141, %142 : vector<16x1xf32>
    %144 = vector.broadcast %136 : vector<16x1xf32> to vector<16x32xf32>
    %145 = arith.subf %132, %144 : vector<16x32xf32>
    %cst_56 = arith.constant 9.99999974E-6 : f32
    %146 = vector.broadcast %cst_56 : f32 to vector<16x1xf32>
    %147 = arith.addf %143, %146 : vector<16x1xf32>
    %148 = math.rsqrt %147 : vector<16x1xf32>
    %149 = vector.broadcast %148 : vector<16x1xf32> to vector<16x32xf32>
    %150 = arith.mulf %145, %149 : vector<16x32xf32>
    %151 = vector.broadcast %15 : vector<1x32xf32> to vector<16x32xf32>
    %152 = arith.mulf %150, %151 : vector<16x32xf32>
    %153 = vector.broadcast %16 : vector<1x32xf32> to vector<16x32xf32>
    %154 = arith.addf %152, %153 : vector<16x32xf32>
    %c0_57 = arith.constant 0 : index
    %c0_58 = arith.constant 0 : index
    %155 = vector.load %arg2[%c0_57, %c0_58] : memref<2x16xf32, #tpu.memory_space<vmem>>, vector<2x16xf32>
    %cst_59 = arith.constant dense<0.000000e+00> : vector<2x32xf32>
    %156 = tpu.matmul %155, %154, %cst_59 {dimension_numbers = #tpu.dot_dimension_numbers<[1], [0], [0], [1], [0, 0, 1, 1], [], []>} : vector<2x16xf32>, vector<16x32xf32>, vector<2x32xf32> -> vector<2x32xf32>
    %c0_60 = arith.constant 0 : index
    %c0_61 = arith.constant 0 : index
    %157 = vector.load %arg4[%c0_60, %c0_61] : memref<2x16xf32, #tpu.memory_space<vmem>>, vector<2x16xf32>
    %c1 = arith.constant 1 : index
    %c0_62 = arith.constant 0 : index
    %c0_63 = arith.constant 0 : index
    %158 = vector.load %arg11[%c1, %c0_62, %c0_63] : memref<2x16x128xf32, #tpu.memory_space<vmem>>, vector<1x16x128xf32>
    %159 = vector.shape_cast %158 : vector<1x16x128xf32> to vector<16x128xf32>
    %160 = vector.extract_strided_slice %159 {offsets = [0, 0], sizes = [1, 32], strides = [1, 1]} : vector<16x128xf32> to vector<1x32xf32>
    %161 = vector.extract_strided_slice %159 {offsets = [1, 0], sizes = [1, 64], strides = [1, 1]} : vector<16x128xf32> to vector<1x64xf32>
    %162 = vector.extract_strided_slice %159 {offsets = [2, 0], sizes = [1, 32], strides = [1, 1]} : vector<16x128xf32> to vector<1x32xf32>
    %163 = vector.extract_strided_slice %159 {offsets = [3, 0], sizes = [1, 32], strides = [1, 1]} : vector<16x128xf32> to vector<1x32xf32>
    %164 = vector.extract_strided_slice %159 {offsets = [4, 0], sizes = [1, 32], strides = [1, 1]} : vector<16x128xf32> to vector<1x32xf32>
    %165 = vector.extract_strided_slice %159 {offsets = [5, 0], sizes = [1, 128], strides = [1, 1]} : vector<16x128xf32> to vector<1x128xf32>
    %166 = vector.extract_strided_slice %159 {offsets = [6, 0], sizes = [1, 32], strides = [1, 1]} : vector<16x128xf32> to vector<1x32xf32>
    %167 = vector.extract_strided_slice %159 {offsets = [7, 0], sizes = [1, 32], strides = [1, 1]} : vector<16x128xf32> to vector<1x32xf32>
    %168 = vector.extract_strided_slice %159 {offsets = [8, 0], sizes = [1, 32], strides = [1, 1]} : vector<16x128xf32> to vector<1x32xf32>
    %c1_64 = arith.constant 1 : index
    %c0_65 = arith.constant 0 : index
    %c0_66 = arith.constant 0 : index
    %169 = vector.load %arg6[%c1_64, %c0_65, %c0_66] : memref<2x32x32xf32, #tpu.memory_space<vmem>>, vector<1x32x32xf32>
    %170 = vector.shape_cast %169 : vector<1x32x32xf32> to vector<32x32xf32>
    %cst_67 = arith.constant dense<0.000000e+00> : vector<2x32xf32>
    %171 = tpu.matmul %156, %170, %cst_67 {dimension_numbers = #tpu.dot_dimension_numbers<[1], [0], [0], [1], [0, 0, 1, 1], [], []>} : vector<2x32xf32>, vector<32x32xf32>, vector<2x32xf32> -> vector<2x32xf32>
    %172 = vector.broadcast %160 : vector<1x32xf32> to vector<2x32xf32>
    %173 = arith.addf %171, %172 : vector<2x32xf32>
    %c1_68 = arith.constant 1 : index
    %c0_69 = arith.constant 0 : index
    %c0_70 = arith.constant 0 : index
    %174 = vector.load %arg7[%c1_68, %c0_69, %c0_70] : memref<2x32x64xf32, #tpu.memory_space<vmem>>, vector<1x32x64xf32>
    %175 = vector.shape_cast %174 : vector<1x32x64xf32> to vector<32x64xf32>
    %cst_71 = arith.constant dense<0.000000e+00> : vector<16x64xf32>
    %176 = tpu.matmul %154, %175, %cst_71 {dimension_numbers = #tpu.dot_dimension_numbers<[1], [0], [0], [1], [0, 0, 1, 1], [], []>} : vector<16x32xf32>, vector<32x64xf32>, vector<16x64xf32> -> vector<16x64xf32>
    %177 = vector.broadcast %161 : vector<1x64xf32> to vector<16x64xf32>
    %178 = arith.addf %176, %177 : vector<16x64xf32>
    %179 = vector.extract_strided_slice %173 {offsets = [0, 0], sizes = [2, 8], strides = [1, 1]} : vector<2x32xf32> to vector<2x8xf32>
    %180 = vector.extract_strided_slice %178 {offsets = [0, 0], sizes = [16, 8], strides = [1, 1]} : vector<16x64xf32> to vector<16x8xf32>
    %181 = vector.extract_strided_slice %178 {offsets = [0, 32], sizes = [16, 8], strides = [1, 1]} : vector<16x64xf32> to vector<16x8xf32>
    %cst_72 = arith.constant dense<0.000000e+00> : vector<2x16xf32>
    %182 = tpu.matmul %179, %180, %cst_72 {dimension_numbers = #tpu.dot_dimension_numbers<[1], [1], [0], [0], [0, 0, 1, 0], [], []>} : vector<2x8xf32>, vector<16x8xf32>, vector<2x16xf32> -> vector<2x16xf32>
    %183 = arith.addf %182, %157 : vector<2x16xf32>
    %cst_73 = arith.constant dense<0xFF800000> : vector<2xf32>
    %184 = vector.multi_reduction <maximumf>, %183, %cst_73 [1] : vector<2x16xf32> to vector<2xf32>
    %185 = vector.shape_cast %184 : vector<2xf32> to vector<2x1xf32>
    %186 = vector.broadcast %185 : vector<2x1xf32> to vector<2x16xf32>
    %187 = arith.subf %183, %186 : vector<2x16xf32>
    %188 = math.exp %187 : vector<2x16xf32>
    %cst_74 = arith.constant dense<0.000000e+00> : vector<2xf32>
    %189 = vector.multi_reduction <add>, %188, %cst_74 [1] : vector<2x16xf32> to vector<2xf32>
    %190 = vector.shape_cast %189 : vector<2xf32> to vector<2x1xf32>
    %191 = tpu.reciprocal %190 {approx = true} : vector<2x1xf32> -> vector<2x1xf32>
    %192 = vector.broadcast %191 : vector<2x1xf32> to vector<2x16xf32>
    %193 = arith.mulf %188, %192 : vector<2x16xf32>
    %cst_75 = arith.constant dense<0.000000e+00> : vector<2x8xf32>
    %194 = tpu.matmul %193, %181, %cst_75 {dimension_numbers = #tpu.dot_dimension_numbers<[1], [0], [0], [1], [0, 0, 1, 1], [], []>} : vector<2x16xf32>, vector<16x8xf32>, vector<2x8xf32> -> vector<2x8xf32>
    %195 = vector.extract_strided_slice %173 {offsets = [0, 8], sizes = [2, 8], strides = [1, 1]} : vector<2x32xf32> to vector<2x8xf32>
    %196 = vector.extract_strided_slice %178 {offsets = [0, 8], sizes = [16, 8], strides = [1, 1]} : vector<16x64xf32> to vector<16x8xf32>
    %197 = vector.extract_strided_slice %178 {offsets = [0, 40], sizes = [16, 8], strides = [1, 1]} : vector<16x64xf32> to vector<16x8xf32>
    %cst_76 = arith.constant dense<0.000000e+00> : vector<2x16xf32>
    %198 = tpu.matmul %195, %196, %cst_76 {dimension_numbers = #tpu.dot_dimension_numbers<[1], [1], [0], [0], [0, 0, 1, 0], [], []>} : vector<2x8xf32>, vector<16x8xf32>, vector<2x16xf32> -> vector<2x16xf32>
    %199 = arith.addf %198, %157 : vector<2x16xf32>
    %cst_77 = arith.constant dense<0xFF800000> : vector<2xf32>
    %200 = vector.multi_reduction <maximumf>, %199, %cst_77 [1] : vector<2x16xf32> to vector<2xf32>
    %201 = vector.shape_cast %200 : vector<2xf32> to vector<2x1xf32>
    %202 = vector.broadcast %201 : vector<2x1xf32> to vector<2x16xf32>
    %203 = arith.subf %199, %202 : vector<2x16xf32>
    %204 = math.exp %203 : vector<2x16xf32>
    %cst_78 = arith.constant dense<0.000000e+00> : vector<2xf32>
    %205 = vector.multi_reduction <add>, %204, %cst_78 [1] : vector<2x16xf32> to vector<2xf32>
    %206 = vector.shape_cast %205 : vector<2xf32> to vector<2x1xf32>
    %207 = tpu.reciprocal %206 {approx = true} : vector<2x1xf32> -> vector<2x1xf32>
    %208 = vector.broadcast %207 : vector<2x1xf32> to vector<2x16xf32>
    %209 = arith.mulf %204, %208 : vector<2x16xf32>
    %cst_79 = arith.constant dense<0.000000e+00> : vector<2x8xf32>
    %210 = tpu.matmul %209, %197, %cst_79 {dimension_numbers = #tpu.dot_dimension_numbers<[1], [0], [0], [1], [0, 0, 1, 1], [], []>} : vector<2x16xf32>, vector<16x8xf32>, vector<2x8xf32> -> vector<2x8xf32>
    %211 = vector.extract_strided_slice %173 {offsets = [0, 16], sizes = [2, 8], strides = [1, 1]} : vector<2x32xf32> to vector<2x8xf32>
    %212 = vector.extract_strided_slice %178 {offsets = [0, 16], sizes = [16, 8], strides = [1, 1]} : vector<16x64xf32> to vector<16x8xf32>
    %213 = vector.extract_strided_slice %178 {offsets = [0, 48], sizes = [16, 8], strides = [1, 1]} : vector<16x64xf32> to vector<16x8xf32>
    %cst_80 = arith.constant dense<0.000000e+00> : vector<2x16xf32>
    %214 = tpu.matmul %211, %212, %cst_80 {dimension_numbers = #tpu.dot_dimension_numbers<[1], [1], [0], [0], [0, 0, 1, 0], [], []>} : vector<2x8xf32>, vector<16x8xf32>, vector<2x16xf32> -> vector<2x16xf32>
    %215 = arith.addf %214, %157 : vector<2x16xf32>
    %cst_81 = arith.constant dense<0xFF800000> : vector<2xf32>
    %216 = vector.multi_reduction <maximumf>, %215, %cst_81 [1] : vector<2x16xf32> to vector<2xf32>
    %217 = vector.shape_cast %216 : vector<2xf32> to vector<2x1xf32>
    %218 = vector.broadcast %217 : vector<2x1xf32> to vector<2x16xf32>
    %219 = arith.subf %215, %218 : vector<2x16xf32>
    %220 = math.exp %219 : vector<2x16xf32>
    %cst_82 = arith.constant dense<0.000000e+00> : vector<2xf32>
    %221 = vector.multi_reduction <add>, %220, %cst_82 [1] : vector<2x16xf32> to vector<2xf32>
    %222 = vector.shape_cast %221 : vector<2xf32> to vector<2x1xf32>
    %223 = tpu.reciprocal %222 {approx = true} : vector<2x1xf32> -> vector<2x1xf32>
    %224 = vector.broadcast %223 : vector<2x1xf32> to vector<2x16xf32>
    %225 = arith.mulf %220, %224 : vector<2x16xf32>
    %cst_83 = arith.constant dense<0.000000e+00> : vector<2x8xf32>
    %226 = tpu.matmul %225, %213, %cst_83 {dimension_numbers = #tpu.dot_dimension_numbers<[1], [0], [0], [1], [0, 0, 1, 1], [], []>} : vector<2x16xf32>, vector<16x8xf32>, vector<2x8xf32> -> vector<2x8xf32>
    %227 = vector.extract_strided_slice %173 {offsets = [0, 24], sizes = [2, 8], strides = [1, 1]} : vector<2x32xf32> to vector<2x8xf32>
    %228 = vector.extract_strided_slice %178 {offsets = [0, 24], sizes = [16, 8], strides = [1, 1]} : vector<16x64xf32> to vector<16x8xf32>
    %229 = vector.extract_strided_slice %178 {offsets = [0, 56], sizes = [16, 8], strides = [1, 1]} : vector<16x64xf32> to vector<16x8xf32>
    %cst_84 = arith.constant dense<0.000000e+00> : vector<2x16xf32>
    %230 = tpu.matmul %227, %228, %cst_84 {dimension_numbers = #tpu.dot_dimension_numbers<[1], [1], [0], [0], [0, 0, 1, 0], [], []>} : vector<2x8xf32>, vector<16x8xf32>, vector<2x16xf32> -> vector<2x16xf32>
    %231 = arith.addf %230, %157 : vector<2x16xf32>
    %cst_85 = arith.constant dense<0xFF800000> : vector<2xf32>
    %232 = vector.multi_reduction <maximumf>, %231, %cst_85 [1] : vector<2x16xf32> to vector<2xf32>
    %233 = vector.shape_cast %232 : vector<2xf32> to vector<2x1xf32>
    %234 = vector.broadcast %233 : vector<2x1xf32> to vector<2x16xf32>
    %235 = arith.subf %231, %234 : vector<2x16xf32>
    %236 = math.exp %235 : vector<2x16xf32>
    %cst_86 = arith.constant dense<0.000000e+00> : vector<2xf32>
    %237 = vector.multi_reduction <add>, %236, %cst_86 [1] : vector<2x16xf32> to vector<2xf32>
    %238 = vector.shape_cast %237 : vector<2xf32> to vector<2x1xf32>
    %239 = tpu.reciprocal %238 {approx = true} : vector<2x1xf32> -> vector<2x1xf32>
    %240 = vector.broadcast %239 : vector<2x1xf32> to vector<2x16xf32>
    %241 = arith.mulf %236, %240 : vector<2x16xf32>
    %cst_87 = arith.constant dense<0.000000e+00> : vector<2x8xf32>
    %242 = tpu.matmul %241, %229, %cst_87 {dimension_numbers = #tpu.dot_dimension_numbers<[1], [0], [0], [1], [0, 0, 1, 1], [], []>} : vector<2x16xf32>, vector<16x8xf32>, vector<2x8xf32> -> vector<2x8xf32>
    %243 = tpu.concatenate %194, %210, %226, %242 in 1 : vector<2x8xf32>, vector<2x8xf32>, vector<2x8xf32>, vector<2x8xf32> -> vector<2x32xf32>
    %c1_88 = arith.constant 1 : index
    %c0_89 = arith.constant 0 : index
    %c0_90 = arith.constant 0 : index
    %244 = vector.load %arg8[%c1_88, %c0_89, %c0_90] : memref<2x32x32xf32, #tpu.memory_space<vmem>>, vector<1x32x32xf32>
    %245 = vector.shape_cast %244 : vector<1x32x32xf32> to vector<32x32xf32>
    %cst_91 = arith.constant dense<0.000000e+00> : vector<2x32xf32>
    %246 = tpu.matmul %243, %245, %cst_91 {dimension_numbers = #tpu.dot_dimension_numbers<[1], [0], [0], [1], [0, 0, 1, 1], [], []>} : vector<2x32xf32>, vector<32x32xf32>, vector<2x32xf32> -> vector<2x32xf32>
    %247 = vector.broadcast %162 : vector<1x32xf32> to vector<2x32xf32>
    %248 = arith.addf %246, %247 : vector<2x32xf32>
    %249 = arith.addf %156, %248 : vector<2x32xf32>
    %cst_92 = arith.constant dense<0.000000e+00> : vector<2xf32>
    %250 = vector.multi_reduction <add>, %249, %cst_92 [1] : vector<2x32xf32> to vector<2xf32>
    %251 = vector.shape_cast %250 : vector<2xf32> to vector<2x1xf32>
    %cst_93 = arith.constant 3.200000e+01 : f32
    %252 = vector.broadcast %cst_93 : f32 to vector<2x1xf32>
    %253 = arith.divf %251, %252 : vector<2x1xf32>
    %254 = vector.broadcast %253 : vector<2x1xf32> to vector<2x32xf32>
    %255 = arith.subf %249, %254 : vector<2x32xf32>
    %256 = arith.mulf %255, %255 : vector<2x32xf32>
    %cst_94 = arith.constant dense<0.000000e+00> : vector<2xf32>
    %257 = vector.multi_reduction <add>, %256, %cst_94 [1] : vector<2x32xf32> to vector<2xf32>
    %258 = vector.shape_cast %257 : vector<2xf32> to vector<2x1xf32>
    %cst_95 = arith.constant 3.200000e+01 : f32
    %259 = vector.broadcast %cst_95 : f32 to vector<2x1xf32>
    %260 = arith.divf %258, %259 : vector<2x1xf32>
    %261 = vector.broadcast %253 : vector<2x1xf32> to vector<2x32xf32>
    %262 = arith.subf %249, %261 : vector<2x32xf32>
    %cst_96 = arith.constant 9.99999974E-6 : f32
    %263 = vector.broadcast %cst_96 : f32 to vector<2x1xf32>
    %264 = arith.addf %260, %263 : vector<2x1xf32>
    %265 = math.rsqrt %264 : vector<2x1xf32>
    %266 = vector.broadcast %265 : vector<2x1xf32> to vector<2x32xf32>
    %267 = arith.mulf %262, %266 : vector<2x32xf32>
    %268 = vector.broadcast %163 : vector<1x32xf32> to vector<2x32xf32>
    %269 = arith.mulf %267, %268 : vector<2x32xf32>
    %270 = vector.broadcast %164 : vector<1x32xf32> to vector<2x32xf32>
    %271 = arith.addf %269, %270 : vector<2x32xf32>
    %c1_97 = arith.constant 1 : index
    %c0_98 = arith.constant 0 : index
    %c0_99 = arith.constant 0 : index
    %272 = vector.load %arg9[%c1_97, %c0_98, %c0_99] : memref<2x32x128xf32, #tpu.memory_space<vmem>>, vector<1x32x128xf32>
    %273 = vector.shape_cast %272 : vector<1x32x128xf32> to vector<32x128xf32>
    %cst_100 = arith.constant dense<0.000000e+00> : vector<2x128xf32>
    %274 = tpu.matmul %271, %273, %cst_100 {dimension_numbers = #tpu.dot_dimension_numbers<[1], [0], [0], [1], [0, 0, 1, 1], [], []>} : vector<2x32xf32>, vector<32x128xf32>, vector<2x128xf32> -> vector<2x128xf32>
    %275 = vector.broadcast %165 : vector<1x128xf32> to vector<2x128xf32>
    %276 = arith.addf %274, %275 : vector<2x128xf32>
    %cst_101 = arith.constant 0.000000e+00 : f32
    %277 = vector.broadcast %cst_101 : f32 to vector<2x128xf32>
    %278 = arith.maximumf %276, %277 : vector<2x128xf32>
    %c1_102 = arith.constant 1 : index
    %c0_103 = arith.constant 0 : index
    %c0_104 = arith.constant 0 : index
    %279 = vector.load %arg10[%c1_102, %c0_103, %c0_104] : memref<2x128x32xf32, #tpu.memory_space<vmem>>, vector<1x128x32xf32>
    %280 = vector.shape_cast %279 : vector<1x128x32xf32> to vector<128x32xf32>
    %cst_105 = arith.constant dense<0.000000e+00> : vector<2x32xf32>
    %281 = tpu.matmul %278, %280, %cst_105 {dimension_numbers = #tpu.dot_dimension_numbers<[1], [0], [0], [1], [0, 0, 1, 1], [], []>} : vector<2x128xf32>, vector<128x32xf32>, vector<2x32xf32> -> vector<2x32xf32>
    %282 = vector.broadcast %166 : vector<1x32xf32> to vector<2x32xf32>
    %283 = arith.addf %281, %282 : vector<2x32xf32>
    %284 = arith.addf %271, %283 : vector<2x32xf32>
    %cst_106 = arith.constant dense<0.000000e+00> : vector<2xf32>
    %285 = vector.multi_reduction <add>, %284, %cst_106 [1] : vector<2x32xf32> to vector<2xf32>
    %286 = vector.shape_cast %285 : vector<2xf32> to vector<2x1xf32>
    %cst_107 = arith.constant 3.200000e+01 : f32
    %287 = vector.broadcast %cst_107 : f32 to vector<2x1xf32>
    %288 = arith.divf %286, %287 : vector<2x1xf32>
    %289 = vector.broadcast %288 : vector<2x1xf32> to vector<2x32xf32>
    %290 = arith.subf %284, %289 : vector<2x32xf32>
    %291 = arith.mulf %290, %290 : vector<2x32xf32>
    %cst_108 = arith.constant dense<0.000000e+00> : vector<2xf32>
    %292 = vector.multi_reduction <add>, %291, %cst_108 [1] : vector<2x32xf32> to vector<2xf32>
    %293 = vector.shape_cast %292 : vector<2xf32> to vector<2x1xf32>
    %cst_109 = arith.constant 3.200000e+01 : f32
    %294 = vector.broadcast %cst_109 : f32 to vector<2x1xf32>
    %295 = arith.divf %293, %294 : vector<2x1xf32>
    %296 = vector.broadcast %288 : vector<2x1xf32> to vector<2x32xf32>
    %297 = arith.subf %284, %296 : vector<2x32xf32>
    %cst_110 = arith.constant 9.99999974E-6 : f32
    %298 = vector.broadcast %cst_110 : f32 to vector<2x1xf32>
    %299 = arith.addf %295, %298 : vector<2x1xf32>
    %300 = math.rsqrt %299 : vector<2x1xf32>
    %301 = vector.broadcast %300 : vector<2x1xf32> to vector<2x32xf32>
    %302 = arith.mulf %297, %301 : vector<2x32xf32>
    %303 = vector.broadcast %167 : vector<1x32xf32> to vector<2x32xf32>
    %304 = arith.mulf %302, %303 : vector<2x32xf32>
    %305 = vector.broadcast %168 : vector<1x32xf32> to vector<2x32xf32>
    %306 = arith.addf %304, %305 : vector<2x32xf32>
    %c0_111 = arith.constant 0 : index
    %c0_112 = arith.constant 0 : index
    %307 = vector.load %arg12[%c0_111, %c0_112] : memref<32x16xf32, #tpu.memory_space<vmem>>, vector<32x16xf32>
    %cst_113 = arith.constant dense<0.000000e+00> : vector<2x16xf32>
    %308 = tpu.matmul %306, %307, %cst_113 {dimension_numbers = #tpu.dot_dimension_numbers<[1], [0], [0], [1], [0, 0, 1, 1], [], []>} : vector<2x32xf32>, vector<32x16xf32>, vector<2x16xf32> -> vector<2x16xf32>
    %c0_114 = arith.constant 0 : index
    %c0_115 = arith.constant 0 : index
    %309 = vector.load %arg13[%c0_114, %c0_115] : memref<1x16xf32, #tpu.memory_space<vmem>>, vector<1x16xf32>
    %310 = vector.broadcast %309 : vector<1x16xf32> to vector<2x16xf32>
    %311 = arith.addf %308, %310 : vector<2x16xf32>
    %cst_116 = arith.constant 0.000000e+00 : f32
    %312 = vector.broadcast %cst_116 : f32 to vector<2x16xf32>
    %313 = arith.maximumf %311, %312 : vector<2x16xf32>
    %c0_117 = arith.constant 0 : index
    %c0_118 = arith.constant 0 : index
    %314 = vector.load %arg14[%c0_117, %c0_118] : memref<16x4xf32, #tpu.memory_space<vmem>>, vector<16x4xf32>
    %cst_119 = arith.constant dense<0.000000e+00> : vector<2x4xf32>
    %315 = tpu.matmul %313, %314, %cst_119 {dimension_numbers = #tpu.dot_dimension_numbers<[1], [0], [0], [1], [0, 0, 1, 1], [], []>} : vector<2x16xf32>, vector<16x4xf32>, vector<2x4xf32> -> vector<2x4xf32>
    %c0_120 = arith.constant 0 : index
    %c0_121 = arith.constant 0 : index
    %316 = vector.load %arg15[%c0_120, %c0_121] : memref<1x4xf32, #tpu.memory_space<vmem>>, vector<1x4xf32>
    %317 = vector.broadcast %316 : vector<1x4xf32> to vector<2x4xf32>
    %318 = arith.addf %315, %317 : vector<2x4xf32>
    %319 = arith.negf %318 : vector<2x4xf32>
    %320 = math.exp %319 : vector<2x4xf32>
    %cst_122 = arith.constant 1.000000e+00 : f32
    %321 = vector.broadcast %cst_122 : f32 to vector<2x4xf32>
    %322 = arith.addf %321, %320 : vector<2x4xf32>
    %323 = arith.divf %321, %322 : vector<2x4xf32>
    %c0_123 = arith.constant 0 : index
    %c0_124 = arith.constant 0 : index
    %324 = vector.load %arg16[%c0_123, %c0_124] : memref<2x4xf32, #tpu.memory_space<vmem>>, vector<2x4xf32>
    tpu.vector_store %arg16[%c0_123, %c0_124], %323 {strides = array<i32>} : memref<2x4xf32, #tpu.memory_space<vmem>>, vector<2x4xf32>,
    return
  }
}

</mosaic_0001>

<bundles_post_ra>
// kernel: transformer_forward.1
= control target key start
LH: loop header
LB: loop body
LE: loop exit
PB: predicated region body
PF: predicated region fallthrough
CT: control target
= control target key end

     0   :  { %s4586_s0 = inlined_call_operand.vmem [shape: f32[16,8], index: 0, kind: input, shape index: {}]   ;;  %s4587_s1 = inlined_call_operand.vmem [shape: f32[16,32], index: 1, kind: input, shape index: {}]   ;;  %s4588_s2 = inlined_call_operand.vmem [shape: f32[2,16], index: 2, kind: input, shape index: {}]   ;;  %s4589_s3 = inlined_call_operand.vmem [shape: f32[16,16], index: 3, kind: input, shape index: {}]   ;;  %s4590_s4 = inlined_call_operand.vmem [shape: f32[2,16], index: 4, kind: input, shape index: {}]   ;;  %s4591_s5 = inlined_call_operand.vmem [shape: f32[8,32], index: 5, kind: input, shape index: {}]   ;;  %s4592_s6 = inlined_call_operand.vmem [shape: f32[2,32,32], index: 6, kind: input, shape index: {}]   ;;  %s4593_s7 = inlined_call_operand.vmem [shape: f32[2,32,64], index: 7, kind: input, shape index: {}]   ;;  %s4594_s8 = inlined_call_operand.vmem [shape: f32[2,32,32], index: 8, kind: input, shape index: {}]   ;;  %s4595_s9 = inlined_call_operand.vmem [shape: f32[2,32,128], index: 9, kind: input, shape index: {}]   ;;  %s4596_s10 = inlined_call_operand.vmem [shape: f32[2,128,32], index: 10, kind: input, shape index: {}]   ;;  %s4597_s11 = inlined_call_operand.vmem [shape: f32[2,16,128], index: 11, kind: input, shape index: {}]   ;;  %s4598_s12 = inlined_call_operand.vmem [shape: f32[32,16], index: 12, kind: input, shape index: {}]   ;;  %s4599_s13 = inlined_call_operand.vmem [shape: f32[1,16], index: 13, kind: input, shape index: {}]   ;;  %s4600_s14 = inlined_call_operand.vmem [shape: f32[16,4], index: 14, kind: input, shape index: {}]   ;;  %s4601_s15 = inlined_call_operand.vmem [shape: f32[1,4], index: 15, kind: input, shape index: {}]   ;;  %s4602_s16 = inlined_call_operand.hbm [shape: f32[2,4], index: 16, kind: output, shape index: {}]  }
   0x1   :  { %4606 = sst [smem:[#allocation5_spill]] %s4586_s0 }
   0x2   :  { %v56_v0 = vld [vmem:[%s4591_s5] sm:$0xff]  ;;  %s4607_s25 = sld [smem:[#allocation5_spill]]  ;;  %vm59_vm0 = vcmask 64512   ;;  %v146_v4 = vld [vmem:[%s4592_s6 + $0x8] sm:$0xff] }
   0x3   :  { %3192 = vmatprep.subr.mxu0 %v56_v0  ;;  %v145_v3 = vld [vmem:[%s4592_s6] sm:$0xff] }
   0x4   :  { %3193 = vmatpush3.msra.mxu0 %v56_v0  ;;  %v3492_v5 = vpack.c.bf16 %v146_v4, %v145_v3 }
   0x8   :  { %v54_v1 = vld [vmem:[%s4607_s25] sm:$0xff]  ;;  %v55_v2 = vld [vmem:[%s4607_s25 + $0x8] sm:$0xff] }
   0x9   :  { %3194 = vmatprep.mubr.msk.f32.mxu0 %vm59_vm0, %v54_v1 }
   0xa   :  { %21 = vsyncpa [#allocation3], 0  ;;  %3195 = vmatmul.mubr.msk.f32.vlgmr.msra.gmra.mrb[0].mxu0 %vm59_vm0, %v55_v2  ;;  %3493 = vmatprep.subr.bf16.mxu1 %v3492_v5  ;;  %v147_v6 = vld [vmem:[%s4592_s6 + $0x10] sm:$0xff]  ;;  %v148_v7 = vld [vmem:[%s4592_s6 + $0x18] sm:$0xff]  ;;  %vm153_vm1 = vcmask 261120   ;;  %v149_v21 = vlaneseq  ;;  %s3858_s17 = smov 120  }
   0xb   :  { %3495 = vmatpush3.bf16.msra.mxu1 %v3492_v5  ;;  %v3496_v8 = vpack.c.bf16 %v148_v7, %v147_v6  ;;  %v235_v9 = vld [vmem:[%s4593_s7] sm:$0xff]  ;;  %v236_v10 = vld [vmem:[%s4593_s7 + $0x8] sm:$0xff]  ;;  %v237_v15 = vld [vmem:[%s4593_s7 + $0x10] sm:$0xff]  ;;  %vm405_vm3 = vcmask 130048   ;;  %s3859_s22 = smov 96   ;;  %s3861_s23 = smov 88  }
   0xc   :  { %v3500_v11 = vpack.c.bf16 %v236_v10, %v235_v9  ;;  %v57_v12 = vld [vmem:[%s4587_s1] sm:$0xff]  ;;  %v58_v13 = vld [vmem:[%s4587_s1 + $0x8] sm:$0xff]  ;;  %v238_v16 = vld [vmem:[%s4593_s7 + $0x18] sm:$0xff]  ;;  %v4010_v22 = vshrl.u32 %v149_v21, 7  ;;  %s3862_s24 = smov 104   ;;  %s3863_s25 = smov 80  }
   0xd   :  { %3497 = vmatprep.subr.bf16.mxu1 %v3496_v8  ;;  %v3504_v20 = vpack.c.bf16 %v238_v16, %v237_v15  ;;  %v4018_v24 = vld [vmem:[%s4597_s11] sm:$0xff]  ;;  %vm4032_vm2 = vmpackc.low %vm59_vm0, %vm59_vm0  ;;  %v4058_v41 = vld [vmem:[%s4589_s3 + $0x8] sm:$0xff]  ;;  %s4605_s26 = smov 8   ;;  %s3865_s27 = smov 16   ;;  %vm1143_vm4 = vcmask 195584   ;;  %vm3869_vm5 = vmmov 0  }
   0xe   :  { %v4013_v23 = vsub.s32 0, %v4010_v22  ;;  %v241_v28 = vsub.s32 1, %v4010_v22  ;;  %v4053_v39 = vld [vmem:[%s4589_s3] sm:$0xff]  ;;  %s3860_s3 = smov 112   ;;  %s3866_s28 = smov 72   ;;  %vm1831_vm6 = vcmask 123904  }
   0xf   :  { %3499 = vmatpush3.bf16.msra.mxu1 %v3496_v8  ;;  %s4604_s21 = smov 24   ;;  %vm2536_vm7 = vcmask 254976   ;;  %vm2931_vm8 = vcmask 25600  }
  0x10   :  { %3501 = vmatprep.subr.bf16.mxu1 %v3500_v11  ;;  %v152_v25 = vrot.slane %v4018_v24, %v4013_v23  ;;  %v242_v30 = vrot.slane %v4018_v24, %v241_v28 }
  0xdd   :  { %v3196_v14 = vpop.f32.mrb[0].mxu0 }
  0xde   :  { %v132_v17 = vpop.f32.mrb[1].mxu0  ;;  %v4000_v19 = vadd.f32 %v3196_v14, %v58_v13 }
  0xdf   :  { %v3998_v18 = vadd.f32 %v132_v17, %v57_v12 }
  0xe1   :  { %3205 = vmatprep.mubr.msk.f32.mxu1 %vm153_vm1, %v3998_v18 }
  0xe2   :  { %3206 = vmatmul.mubr.msk.f32.vlgmr.msra.gmra.mrb[0].mxu1 %vm153_vm1, %v4000_v19 }
  0xe3   :  { %3503 = vmatpush3.bf16.msra.mxu1 %v3500_v11  ;;  %3216 = vmatprep.mubr.msk.f32.mxu1 %vm153_vm1, %v3998_v18 }
  0xe4   :  { %3505 = vmatprep.subr.bf16.mxu1 %v3504_v20 }
  0xe7   :  { %3507 = vmatpush3.bf16.msra.mxu1 %v3504_v20 }
  0xea   :  { %3217 = vmatmul.mubr.msk.f32.vlgmr.msra.gmra.mrb[2].mxu1 %vm153_vm1, %v4000_v19 }
 0x1b5   :  { %v3207_v26 = vpop.f32.mrb[0].mxu1 }
 0x1b6   :  { %v226_v27 = vpop.f32.mrb[1].mxu1  ;;  %v4046_v38 = vadd.f32 %v3207_v26, %v152_v25 }
 0x1b7   :  { %v4023_v29 = vadd.f32 %v226_v27, %v152_v25 }
 0x1b9   :  { %3223 = vmatprep.mubr.msk.f32.mxu1 %vm59_vm0, %v4023_v29 }
 0x1bd   :  { %v3218_v31 = vpop.f32.mrb[2].mxu1 }
 0x1be   :  { %v315_v32 = vadd.f32 %v3218_v31, %v242_v30  ;;  %v309_v33 = vpop.f32.mrb[3].mxu1 }
 0x1bf   :  { %v310_v34 = vadd.f32 %v309_v33, %v242_v30 }
 0x1c1   :  { %v4036_v36 = vpack.i.bf16 %v315_v32, %v310_v34  ;;  %v3508_v37 = vpack.c.bf16 %v315_v32, %v310_v34 }
 0x1c3   :  { %3706 = vrot.lane.b32.xlu1 %v4036_v36, %s3858_s17  ;;  %3510 = vmatprep.subr.msk.bf16.mxu1 %vm4032_vm2, %v3508_v37 }
 0x1c4   :  { %3513 = vmatpush3.bf16.xpose.msk.msra.mxu1 %vm4032_vm2, %v3508_v37 }
 0x1c7   :  { %515 = vrot.lane.b32.xlu1 %v4023_v29, %s3858_s17 }
 0x1cb   :  { %3224 = vmatmul.mubr.msk.f32.vlgmr.msra.gmra.mrb[4].mxu1 %vm59_vm0, %v4046_v38 }
 0x235   :  { %v3707_v50 = vpop.permute.xlu1 %3706 }
 0x236   :  { %v3709_v54 = vunpack.i.h.bf16 %v3707_v50  ;;  %v3708_v56 = vunpack.i.l.bf16 %v3707_v50 }
 0x238   :  { %v3518_v60 = vpack.c.bf16 %v3709_v54, %v3708_v56 }
 0x239   :  { %v516_v1 = vpop.permute.xlu1 %515 }
 0x29e   :  { %v3225_v40 = vpop.f32.mrb[4].mxu1 }
 0x29f   :  { %v396_v42 = vpop.f32.mrb[5].mxu1  ;;  %v402_v44 = vadd.f32 %v3225_v40, %v4058_v41 }
 0x2a0   :  { %v397_v43 = vadd.f32 %v396_v42, %v4053_v39 }
 0x2a1   :  { %v409_v46 = vsel %vm405_vm3, %v402_v44, -inf }
 0x2a2   :  { %v406_v45 = vsel %vm405_vm3, %v397_v43, -inf }
 0x2a3   :  { %407 = vmax.xlane.f32.xlu0 %v406_v45 }
 0x2a7   :  { %410 = vmax.xlane.f32.xlu0 %v409_v46 }
 0x2bd   :  { %3701 = vrot.lane.b32.xlu0 %v4036_v36, %s3859_s22 }
 0x330   :  { %v408_v47 = vpop.xlane.xlu0 %407 }
 0x331   :  { %v412_v48 = vsub.f32 %v397_v43, %v408_v47 }
 0x333   :  { %v414_v52 = vmul.f32 1.442695, %v412_v48 }
 0x334   :  { %v411_v49 = vpop.xlane.xlu0 %410 }
 0x335   :  { %v413_v51 = vsub.f32 %v402_v44, %v411_v49 }
 0x337   :  { %v416_v53 = vmul.f32 1.442695, %v413_v51 }
 0x338   :  { %v3702_v55 = vpop.permute.xlu0 %3701 }
 0x339   :  { %3770 = vpow2.f32 %v416_v53  ;;  %v3704_v57 = vunpack.i.h.bf16 %v3702_v55  ;;  %v3703_v58 = vunpack.i.l.bf16 %v3702_v55 }
 0x33a   :  { %3772 = vpow2.f32 %v414_v52 }
 0x33b   :  { %v3514_v59 = vpack.c.bf16 %v3704_v57, %v3703_v58 }
 0x33d   :  { %3515 = vmatprep.subr.bf16.mxu0 %v3514_v59 }
 0x33e   :  { %3517 = vmatpush3.bf16.msra.mxu0 %v3514_v59 }
 0x33f   :  { %3520 = vmatprep.subr.msk.bf16.mxu0 %vm4032_vm2, %v3518_v60 }
 0x343   :  { %v3771_v61 = vpop.eup %3770 }
 0x344   :  { %v421_v62 = vsel %vm405_vm3, %v3771_v61, 0.0  ;;  %v3773_v63 = vpop.eup %3772 }
 0x345   :  { %422 = vadd.xlane.f32.xlu1 %v421_v62  ;;  %v418_v0 = vsel %vm405_vm3, %v3773_v63, 0.0 }
 0x349   :  { %419 = vadd.xlane.f32.xlu1 %v418_v0 }
 0x35a   :  { %517 = vrot.lane.b32.xlu1 %v4046_v38, %s3858_s17 }
 0x3d2   :  { %v423_v2 = vpop.xlane.xlu1 %422 }
 0x3d3   :  { %3774 = vrcp.f32 %v423_v2 }
 0x3d6   :  { %v420_v3 = vpop.xlane.xlu1 %419 }
 0x3d7   :  { %3776 = vrcp.f32 %v420_v3 }
 0x3da   :  { %v518_v8 = vpop.permute.xlu1 %517 }
 0x3dd   :  { %v3775_v4 = vpop.eup %3774 }
 0x3de   :  { %v427_v7 = vmul.f32 %v3775_v4, %v3771_v61 }
 0x3e1   :  { %v3777_v5 = vpop.eup %3776 }
 0x3e2   :  { %v426_v6 = vmul.f32 %v3777_v5, %v3773_v63 }
 0x3e4   :  { %3230 = vmatprep.mubr.msk.f32.mxu0 %vm405_vm3, %v426_v6 }
 0x3e5   :  { %3231 = vmatmul.mubr.msk.f32.vlgmr.msra.gmra.mrb[2].mxu0 %vm405_vm3, %v427_v7 }
 0x3e6   :  { %3523 = vmatpush3.bf16.xpose.msk.msra.mxu0 %vm4032_vm2, %v3518_v60  ;;  %3237 = vmatprep.mubr.msk.f32.mxu0 %vm59_vm0, %v516_v1 }
 0x3ed   :  { %3238 = vmatmul.mubr.msk.f32.vlgmr.msra.gmra.mrb[4].mxu0 %vm59_vm0, %v518_v8 }
 0x4b8   :  { %v4078_v9 = vpop.f32.mrb[2].mxu0 }
 0x4b9   :  { %v4080_v10 = vpop.f32.mrb[3].mxu0 }
 0x4c0   :  { %v3239_v11 = vpop.f32.mrb[4].mxu0 }
 0x4c1   :  { %v603_v12 = vadd.f32 %v3239_v11, %v4058_v41  ;;  %v597_v13 = vpop.f32.mrb[5].mxu0 }
 0x4c2   :  { %v598_v14 = vadd.f32 %v597_v13, %v4053_v39 }
 0x4c3   :  { %v609_v15 = vsel %vm405_vm3, %v603_v12, -inf }
 0x4c4   :  { %610 = vmax.xlane.f32.xlu1 %v609_v15  ;;  %v606_v16 = vsel %vm405_vm3, %v598_v14, -inf }
 0x4c5   :  { %607 = vmax.xlane.f32.xlu0 %v606_v16 }
 0x4d5   :  { %3716 = vrot.lane.b32.xlu1 %v4036_v36, %s3860_s3 }
 0x4d9   :  { %715 = vrot.lane.b32.xlu1 %v4023_v29, %s3860_s3 }
 0x4dd   :  { %717 = vrot.lane.b32.xlu1 %v4046_v38, %s3860_s3 }
 0x551   :  { %v611_v17 = vpop.xlane.xlu1 %610 }
 0x552   :  { %v613_v20 = vsub.f32 %v603_v12, %v611_v17  ;;  %v608_v21 = vpop.xlane.xlu0 %607 }
 0x553   :  { %v612_v25 = vsub.f32 %v598_v14, %v608_v21 }
 0x554   :  { %v616_v26 = vmul.f32 1.442695, %v613_v20 }
 0x555   :  { %v614_v27 = vmul.f32 1.442695, %v612_v25  ;;  %v3717_v40 = vpop.permute.xlu1 %3716 }
 0x556   :  { %3778 = vpow2.f32 %v616_v26  ;;  %v3719_v43 = vunpack.i.h.bf16 %v3717_v40  ;;  %v3718_v44 = vunpack.i.l.bf16 %v3717_v40 }
 0x557   :  { %3780 = vpow2.f32 %v614_v27 }
 0x558   :  { %v3528_v48 = vpack.c.bf16 %v3719_v43, %v3718_v44 }
 0x559   :  { %v716_v53 = vpop.permute.xlu1 %715 }
 0x55d   :  { %v718_v54 = vpop.permute.xlu1 %717 }
 0x560   :  { %v3779_v30 = vpop.eup %3778 }
 0x561   :  { %v621_v31 = vsel %vm405_vm3, %v3779_v30, 0.0  ;;  %v3781_v32 = vpop.eup %3780 }
 0x562   :  { %622 = vadd.xlane.f32.xlu0 %v621_v31  ;;  %v618_v33 = vsel %vm405_vm3, %v3781_v32, 0.0 }
 0x566   :  { %619 = vadd.xlane.f32.xlu0 %v618_v33 }
 0x57c   :  { %3711 = vrot.lane.b32.xlu0 %v4036_v36, %s3861_s23 }
 0x5ef   :  { %v623_v34 = vpop.xlane.xlu0 %622 }
 0x5f0   :  { %3782 = vrcp.f32 %v623_v34 }
 0x5f3   :  { %v620_v37 = vpop.xlane.xlu0 %619 }
 0x5f4   :  { %3784 = vrcp.f32 %v620_v37 }
 0x5f7   :  { %v3712_v42 = vpop.permute.xlu0 %3711 }
 0x5f8   :  { %v3714_v45 = vunpack.i.h.bf16 %v3712_v42  ;;  %v3713_v46 = vunpack.i.l.bf16 %v3712_v42 }
 0x5fa   :  { %v3524_v47 = vpack.c.bf16 %v3714_v45, %v3713_v46  ;;  %v3783_v49 = vpop.eup %3782 }
 0x5fb   :  { %v627_v52 = vmul.f32 %v3783_v49, %v3779_v30 }
 0x5fc   :  { %3525 = vmatprep.subr.bf16.mxu1 %v3524_v47 }
 0x5fd   :  { %3527 = vmatpush3.bf16.msra.mxu1 %v3524_v47 }
 0x5fe   :  { %v3785_v50 = vpop.eup %3784  ;;  %3530 = vmatprep.subr.msk.bf16.mxu1 %vm4032_vm2, %v3528_v48 }
 0x5ff   :  { %v626_v51 = vmul.f32 %v3785_v50, %v3781_v32 }
 0x601   :  { %3244 = vmatprep.mubr.msk.f32.mxu1 %vm405_vm3, %v626_v51 }
 0x602   :  { %3245 = vmatmul.mubr.msk.f32.vlgmr.msra.gmra.mrb[6].mxu1 %vm405_vm3, %v627_v52 }
 0x603   :  { %3251 = vmatprep.mubr.msk.f32.mxu1 %vm59_vm0, %v716_v53 }
 0x606   :  { %3533 = vmatpush3.bf16.xpose.msk.msra.mxu1 %vm4032_vm2, %v3528_v48 }
 0x60d   :  { %3252 = vmatmul.mubr.msk.f32.vlgmr.msra.gmra.mrb[8].mxu1 %vm59_vm0, %v718_v54 }
 0x6d5   :  { %v4104_v55 = vpop.f32.mrb[6].mxu1 }
 0x6d6   :  { %v4106_v56 = vpop.f32.mrb[7].mxu1 }
 0x6e0   :  { %v3253_v57 = vpop.f32.mrb[8].mxu1 }
 0x6e1   :  { %v803_v58 = vadd.f32 %v3253_v57, %v4058_v41  ;;  %v797_v59 = vpop.f32.mrb[9].mxu1 }
 0x6e2   :  { %v798_v60 = vadd.f32 %v797_v59, %v4053_v39 }
 0x6e3   :  { %v809_v61 = vsel %vm405_vm3, %v803_v58, -inf }
 0x6e4   :  { %810 = vmax.xlane.f32.xlu1 %v809_v61  ;;  %v806_v62 = vsel %vm405_vm3, %v798_v60, -inf }
 0x6e5   :  { %807 = vmax.xlane.f32.xlu0 %v806_v62 }
 0x6f5   :  { %3726 = vrot.lane.b32.xlu1 %v4036_v36, %s3862_s24 }
 0x6f9   :  { %915 = vrot.lane.b32.xlu1 %v4023_v29, %s3862_s24 }
 0x6fd   :  { %917 = vrot.lane.b32.xlu1 %v4046_v38, %s3862_s24 }
 0x771   :  { %v811_v63 = vpop.xlane.xlu1 %810 }
 0x772   :  { %v813_v0 = vsub.f32 %v803_v58, %v811_v63  ;;  %v808_v1 = vpop.xlane.xlu0 %807  ;;  %v1147_v63 = vld [vmem:[%s4594_s8 + $0x8] sm:$0xff] }
 0x773   :  { %v812_v2 = vsub.f32 %v798_v60, %v808_v1 }
 0x774   :  { %v816_v3 = vmul.f32 1.442695, %v813_v0  ;;  %v1148_v0 = vld [vmem:[%s4594_s8 + $0x10] sm:$0xff] }
 0x775   :  { %v814_v4 = vmul.f32 1.442695, %v812_v2  ;;  %v3727_v11 = vpop.permute.xlu1 %3726  ;;  %v1149_v2 = vld [vmem:[%s4594_s8 + $0x18] sm:$0xff] }
 0x776   :  { %3786 = vpow2.f32 %v816_v3  ;;  %v3729_v13 = vunpack.i.h.bf16 %v3727_v11  ;;  %v3728_v14 = vunpack.i.l.bf16 %v3727_v11  ;;  %v3552_v3 = vpack.c.bf16 %v1149_v2, %v1148_v0  ;;  %v1377_v0 = vld [vmem:[%s4596_s10 + $0x50] sm:$0xff] }
 0x777   :  { %3788 = vpow2.f32 %v814_v4 }
 0x778   :  { %v3538_v20 = vpack.c.bf16 %v3729_v13, %v3728_v14 }
 0x779   :  { %v916_v30 = vpop.permute.xlu1 %915 }
 0x77d   :  { %v918_v31 = vpop.permute.xlu1 %917 }
 0x780   :  { %v3787_v5 = vpop.eup %3786 }
 0x781   :  { %v821_v6 = vsel %vm405_vm3, %v3787_v5, 0.0  ;;  %v3789_v7 = vpop.eup %3788 }
 0x782   :  { %822 = vadd.xlane.f32.xlu0 %v821_v6  ;;  %v818_v8 = vsel %vm405_vm3, %v3789_v7, 0.0 }
 0x786   :  { %819 = vadd.xlane.f32.xlu0 %v818_v8 }
 0x79c   :  { %3721 = vrot.lane.b32.xlu0 %v4036_v36, %s3863_s25 }
 0x80f   :  { %v823_v29 = vpop.xlane.xlu0 %822 }
 0x810   :  { %3790 = vrcp.f32 %v823_v29 }
 0x813   :  { %v820_v38 = vpop.xlane.xlu0 %819 }
 0x814   :  { %3792 = vrcp.f32 %v820_v38 }
 0x817   :  { %v3722_v12 = vpop.permute.xlu0 %3721 }
 0x818   :  { %v3724_v15 = vunpack.i.h.bf16 %v3722_v12  ;;  %v3723_v16 = vunpack.i.l.bf16 %v3722_v12 }
 0x81a   :  { %v3534_v17 = vpack.c.bf16 %v3724_v15, %v3723_v16  ;;  %v3791_v21 = vpop.eup %3790 }
 0x81b   :  { %v827_v27 = vmul.f32 %v3791_v21, %v3787_v5 }
 0x81c   :  { %3535 = vmatprep.subr.bf16.mxu0 %v3534_v17 }
 0x81d   :  { %3537 = vmatpush3.bf16.msra.mxu0 %v3534_v17 }
 0x81e   :  { %v3793_v25 = vpop.eup %3792  ;;  %3540 = vmatprep.subr.msk.bf16.mxu0 %vm4032_vm2, %v3538_v20 }
 0x81f   :  { %v826_v26 = vmul.f32 %v3793_v25, %v3789_v7 }
 0x821   :  { %3258 = vmatprep.mubr.msk.f32.mxu0 %vm405_vm3, %v826_v26 }
 0x822   :  { %3259 = vmatmul.mubr.msk.f32.vlgmr.msra.gmra.mrb[6].mxu0 %vm405_vm3, %v827_v27 }
 0x823   :  { %3265 = vmatprep.mubr.msk.f32.mxu0 %vm59_vm0, %v916_v30 }
 0x826   :  { %3543 = vmatpush3.bf16.xpose.msk.msra.mxu0 %vm4032_vm2, %v3538_v20  ;;  %v1152_v20 = vsub.s32 2, %v4010_v22 }
 0x82d   :  { %3266 = vmatmul.mubr.msk.f32.vlgmr.msra.gmra.mrb[8].mxu0 %vm59_vm0, %v918_v31 }
 0x8f5   :  { %v3260_v32 = vpop.f32.mrb[6].mxu0 }
 0x8f6   :  { %v906_v33 = vpop.f32.mrb[7].mxu0 }
 0x900   :  { %v3267_v34 = vpop.f32.mrb[8].mxu0 }
 0x901   :  { %v1003_v37 = vadd.f32 %v3267_v34, %v4058_v41  ;;  %v997_v40 = vpop.f32.mrb[9].mxu0 }
 0x902   :  { %v998_v42 = vadd.f32 %v997_v40, %v4053_v39 }
 0x903   :  { %v1009_v43 = vsel %vm405_vm3, %v1003_v37, -inf }
 0x904   :  { %1010 = vmax.xlane.f32.xlu1 %v1009_v43  ;;  %v1006_v44 = vsel %vm405_vm3, %v998_v42, -inf }
 0x905   :  { %1007 = vmax.xlane.f32.xlu0 %v1006_v44 }
 0x915   :  { %1117 = vrot.lane.b32.xlu1 %v4106_v56, %s4605_s26 }
 0x919   :  { %1119 = vrot.lane.b32.xlu1 %v4104_v55, %s4605_s26 }
 0x91d   :  { %1125 = vrot.lane.b32.xlu1 %v906_v33, %s3865_s27 }
 0x991   :  { %v1011_v41 = vpop.xlane.xlu1 %1010 }
 0x992   :  { %v1013_v45 = vsub.f32 %v1003_v37, %v1011_v41  ;;  %v1008_v46 = vpop.xlane.xlu0 %1007 }
 0x993   :  { %v1012_v39 = vsub.f32 %v998_v42, %v1008_v46  ;;  %v1277_v46 = vld [vmem:[%s4595_s9 + $0x8] sm:$0xff] }
 0x994   :  { %v1016_v47 = vmul.f32 1.442695, %v1013_v45  ;;  %v1276_v45 = vld [vmem:[%s4595_s9] sm:$0xff] }
 0x995   :  { %v1014_v48 = vmul.f32 1.442695, %v1012_v39  ;;  %v1118_v6 = vpop.permute.xlu1 %1117  ;;  %v3556_v39 = vpack.c.bf16 %v1277_v46, %v1276_v45 }
 0x996   :  { %3794 = vpow2.f32 %v1016_v47  ;;  %v1139_v38 = vsel %vm59_vm0, %v4080_v10, %v1118_v6  ;;  %v1153_v10 = vrot.slane %v4018_v24, %v1152_v20  ;;  %v1278_v47 = vld [vmem:[%s4595_s9 + $0x10] sm:$0xff] }
 0x997   :  { %3796 = vpow2.f32 %v1014_v48  ;;  %3557 = vmatprep.subr.bf16.mxu0 %v3556_v39  ;;  %v1279_v48 = vld [vmem:[%s4595_s9 + $0x18] sm:$0xff] }
 0x998   :  { %3559 = vmatpush3.bf16.msra.mxu0 %v3556_v39 }
 0x999   :  { %v1120_v7 = vpop.permute.xlu1 %1119 }
 0x99a   :  { %v1140_v12 = vsel %vm59_vm0, %v4078_v9, %v1120_v7 }
 0x99d   :  { %v1126_v29 = vpop.permute.xlu1 %1125 }
 0x99e   :  { %v1141_v13 = vsel %vm405_vm3, %v1139_v38, %v1126_v29 }
 0x9a0   :  { %v3795_v49 = vpop.eup %3794 }
 0x9a1   :  { %v1021_v50 = vsel %vm405_vm3, %v3795_v49, 0.0  ;;  %v3797_v51 = vpop.eup %3796 }
 0x9a2   :  { %1022 = vadd.xlane.f32.xlu0 %v1021_v50  ;;  %v1018_v52 = vsel %vm405_vm3, %v3797_v51, 0.0  ;;  %v1367_v50 = vld [vmem:[%s4596_s10] sm:$0xff] }
 0x9a6   :  { %1019 = vadd.xlane.f32.xlu0 %v1018_v52  ;;  %v1369_v52 = vld [vmem:[%s4596_s10 + $0x10] sm:$0xff] }
 0x9bc   :  { %3731 = vrot.lane.b32.xlu0 %v4036_v36, %s3866_s28  ;;  %v1146_v36 = vld [vmem:[%s4594_s8] sm:$0xff] }
 0x9bd   :  { %v3548_v1 = vpack.c.bf16 %v1147_v63, %v1146_v36  ;;  %v1376_v36 = vld [vmem:[%s4596_s10 + $0x48] sm:$0xff] }
 0x9c0   :  { %1127 = vrot.lane.b32.xlu0 %v3260_v32, %s3865_s27 }
 0xa2f   :  { %v1023_v53 = vpop.xlane.xlu0 %1022 }
 0xa30   :  { %3798 = vrcp.f32 %v1023_v53 }
 0xa33   :  { %v1020_v54 = vpop.xlane.xlu0 %1019 }
 0xa34   :  { %3800 = vrcp.f32 %v1020_v54  ;;  %v1370_v54 = vld [vmem:[%s4596_s10 + $0x18] sm:$0xff] }
 0xa37   :  { %v3732_v55 = vpop.permute.xlu0 %3731 }
 0xa38   :  { %v3734_v56 = vunpack.i.h.bf16 %v3732_v55  ;;  %v3733_v57 = vunpack.i.l.bf16 %v3732_v55  ;;  %v3568_v55 = vpack.c.bf16 %v1370_v54, %v1369_v52 }
 0xa3a   :  { %v3544_v58 = vpack.c.bf16 %v3734_v56, %v3733_v57  ;;  %v3799_v59 = vpop.eup %3798  ;;  %v1371_v56 = vld [vmem:[%s4596_s10 + $0x20] sm:$0xff]  ;;  %v1372_v57 = vld [vmem:[%s4596_s10 + $0x28] sm:$0xff] }
 0xa3b   :  { %v1027_v62 = vmul.f32 %v3799_v59, %v3795_v49  ;;  %v1128_v8 = vpop.permute.xlu0 %1127  ;;  %v3560_v49 = vpack.c.bf16 %v1279_v48, %v1278_v47  ;;  %v1373_v59 = vld [vmem:[%s4596_s10 + $0x30] sm:$0xff] }
 0xa3c   :  { %3545 = vmatprep.subr.bf16.mxu1 %v3544_v58  ;;  %v1142_v15 = vsel %vm405_vm3, %v1140_v12, %v1128_v8  ;;  %v1266_v12 = vsub.s32 3, %v4010_v22 }
 0xa3d   :  { %3547 = vmatpush3.bf16.msra.mxu1 %v3544_v58  ;;  %3561 = vmatprep.subr.bf16.mxu0 %v3560_v49  ;;  %v3572_v58 = vpack.c.bf16 %v1372_v57, %v1371_v56 }
 0xa3e   :  { %v3801_v60 = vpop.eup %3800  ;;  %3549 = vmatprep.subr.bf16.mxu1 %v3548_v1  ;;  %3563 = vmatpush3.bf16.msra.mxu0 %v3560_v49 }
 0xa3f   :  { %v1026_v61 = vmul.f32 %v3801_v60, %v3797_v51  ;;  %v1368_v51 = vld [vmem:[%s4596_s10 + $0x8] sm:$0xff]  ;;  %v1374_v60 = vld [vmem:[%s4596_s10 + $0x38] sm:$0xff] }
 0xa40   :  { %v3564_v53 = vpack.c.bf16 %v1368_v51, %v1367_v50 }
 0xa41   :  { %3272 = vmatprep.mubr.msk.f32.mxu1 %vm405_vm3, %v1026_v61  ;;  %v3576_v61 = vpack.c.bf16 %v1374_v60, %v1373_v59 }
 0xa42   :  { %3273 = vmatmul.mubr.msk.f32.vlgmr.msra.gmra.mrb[10].mxu1 %vm405_vm3, %v1027_v62  ;;  %v1375_v62 = vld [vmem:[%s4596_s10 + $0x40] sm:$0xff] }
 0xa43   :  { %3551 = vmatpush3.bf16.msra.mxu1 %v3548_v1  ;;  %v3580_v63 = vpack.c.bf16 %v1376_v36, %v1375_v62  ;;  %v1378_v1 = vld [vmem:[%s4596_s10 + $0x58] sm:$0xff]  ;;  %v3868_v62 = vmov 0.0|0.0   ;;  %v3870_v36 = vmov 0.0  }
 0xa44   :  { %3553 = vmatprep.subr.bf16.mxu1 %v3552_v3  ;;  %v3584_v2 = vpack.c.bf16 %v1378_v1, %v1377_v0  ;;  %3596 = vmatprep.subr.bf16.mxu0 %v3868_v62 }
 0xa47   :  { %3555 = vmatpush3.bf16.msra.mxu1 %v3552_v3  ;;  %v1379_v3 = vld [vmem:[%s4596_s10 + $0x60] sm:$0xff] }
 0xa48   :  { %3565 = vmatprep.subr.bf16.mxu1 %v3564_v53 }
 0xb15   :  { %v3274_v4 = vpop.f32.mrb[10].mxu1 }
 0xb16   :  { %1135 = vrot.lane.b32.xlu0 %v3274_v4, %s4604_s21  ;;  %v1106_v5 = vpop.f32.mrb[11].mxu1  ;;  %v1380_v4 = vld [vmem:[%s4596_s10 + $0x68] sm:$0xff] }
 0xb17   :  { %1133 = vrot.lane.b32.xlu1 %v1106_v5, %s4604_s21  ;;  %v3588_v5 = vpack.c.bf16 %v1380_v4, %v1379_v3  ;;  %s4611_s21 = smov 24  }
 0xb88   :  { %v1136_v11 = vpop.permute.xlu0 %1135 }
 0xb89   :  { %v1134_v14 = vpop.permute.xlu1 %1133  ;;  %v1145_v17 = vsel %vm1143_vm4, %v1142_v15, %v1136_v11 }
 0xb8a   :  { %v1144_v16 = vsel %vm1143_vm4, %v1141_v13, %v1134_v14  ;;  %v1272_v13 = vsub.s32 4, %v4010_v22  ;;  %v1267_v14 = vrot.slane %v4018_v24, %v1266_v12 }
 0xb8b   :  { %3283 = vmatprep.mubr.msk.f32.mxu1 %vm153_vm1, %v1144_v16 }
 0xb8c   :  { %3284 = vmatmul.mubr.msk.f32.vlgmr.msra.gmra.mrb[12].mxu1 %vm153_vm1, %v1145_v17  ;;  %v1273_v17 = vrot.slane %v4018_v24, %v1272_v13 }
 0xb8d   :  { %3567 = vmatpush3.bf16.msra.mxu1 %v3564_v53 }
 0xb8e   :  { %3569 = vmatprep.subr.bf16.mxu1 %v3568_v55 }
 0xb91   :  { %3571 = vmatpush3.bf16.msra.mxu1 %v3568_v55 }
 0xb92   :  { %3573 = vmatprep.subr.bf16.mxu1 %v3572_v58 }
 0xb95   :  { %3575 = vmatpush3.bf16.msra.mxu1 %v3572_v58 }
 0xb96   :  { %3577 = vmatprep.subr.bf16.mxu1 %v3576_v61 }
 0xb99   :  { %3579 = vmatpush3.bf16.msra.mxu1 %v3576_v61 }
 0xb9a   :  { %3581 = vmatprep.subr.bf16.mxu1 %v3580_v63 }
 0xb9d   :  { %3583 = vmatpush3.bf16.msra.mxu1 %v3580_v63 }
 0xb9e   :  { %3585 = vmatprep.subr.bf16.mxu1 %v3584_v2 }
 0xba1   :  { %3587 = vmatpush3.bf16.msra.mxu1 %v3584_v2 }
 0xba2   :  { %3589 = vmatprep.subr.bf16.mxu1 %v3588_v5 }
 0xba5   :  { %3591 = vmatpush3.bf16.msra.mxu1 %v3588_v5  ;;  %v1492_v5 = vsub.s32 7, %v4010_v22 }
 0xc5f   :  { %v3285_v9 = vpop.f32.mrb[12].mxu1 }
 0xc60   :  { %v1232_v21 = vadd.f32 %v3285_v9, %v1153_v10  ;;  %v1226_v25 = vpop.f32.mrb[13].mxu1 }
 0xc61   :  { %v1227_v26 = vadd.f32 %v1226_v25, %v1153_v10 }
 0xc62   :  { %v1236_v27 = vadd.f32 %v1232_v21, %v4000_v19 }
 0xc63   :  { %v1235_v30 = vadd.f32 %v1227_v26, %v3998_v18 }
 0xc64   :  { %v1240_v31 = vsel %vm153_vm1, %v1236_v27, 0.0 }
 0xc65   :  { %1241 = vadd.xlane.f32.xlu0 %v1240_v31  ;;  %v1237_v32 = vsel %vm153_vm1, %v1235_v30, 0.0  ;;  %v1382_v31 = vld [vmem:[%s4596_s10 + $0x78] sm:$0xff] }
 0xc66   :  { %1238 = vadd.xlane.f32.xlu1 %v1237_v32 }
 0xcf2   :  { %v1242_v33 = vpop.xlane.xlu0 %1241 }
 0xcf3   :  { %v1245_v34 = vmul.f32 0.03125, %v1242_v33  ;;  %v1239_v37 = vpop.xlane.xlu1 %1238  ;;  %v1282_v33 = vsub.s32 5, %v4010_v22 }
 0xcf4   :  { %v1244_v40 = vmul.f32 0.03125, %v1239_v37 }
 0xcf5   :  { %v4178_v42 = vsub.f32 %v1236_v27, %v1245_v34  ;;  %v1283_v34 = vrot.slane %v4018_v24, %v1282_v33 }
 0xcf6   :  { %v4180_v43 = vsub.f32 %v1235_v30, %v1244_v40  ;;  %v1381_v30 = vld [vmem:[%s4596_s10 + $0x70] sm:$0xff] }
 0xcf7   :  { %v1249_v18 = vmul.f32 %v4178_v42, %v4178_v42  ;;  %v3592_v32 = vpack.c.bf16 %v1382_v31, %v1381_v30  ;;  %v2987_v30 = vld [vmem:[%s4592_s6 + $0x38] sm:$0xff] }
 0xcf8   :  { %v1248_v44 = vmul.f32 %v4180_v43, %v4180_v43 }
 0xcf9   :  { %v1253_v41 = vsel %vm153_vm1, %v1249_v18, 0.0  ;;  %3593 = vmatprep.subr.bf16.mxu1 %v3592_v32  ;;  %v1385_v18 = vsub.s32 6, %v4010_v22  ;;  %v2844_v22 = vld [vmem:[%s4600_s14 + $0x8] sm:$0xff] }
 0xcfa   :  { %v1250_v19 = vsel %vm153_vm1, %v1248_v44, 0.0  ;;  %3595 = vmatpush3.bf16.msra.mxu1 %v3592_v32  ;;  %v2989_v32 = vld [vmem:[%s4593_s7 + $0x20] sm:$0xff] }
 0xcfb   :  { %1251 = vadd.xlane.f32.xlu0 %v1250_v19  ;;  %3620 = vmatprep.subr.bf16.mxu1 %v3868_v62 }
 0xcff   :  { %1254 = vadd.xlane.f32.xlu0 %v1253_v41  ;;  %v1386_v41 = vrot.slane %v4018_v24, %v1385_v18 }
 0xd88   :  { %v1252_v6 = vpop.xlane.xlu0 %1251 }
 0xd89   :  { %v1256_v7 = vmul.f32 0.03125, %v1252_v6  ;;  %v144_v6 = vld [vmem:[%s4597_s11 + $0x8] sm:$0xff] }
 0xd8b   :  { %v1258_v8 = vadd.f32 1e-05, %v1256_v7  ;;  %v1493_v7 = vrot.slane %v4018_v24, %v1492_v5  ;;  %v1502_v24 = vld [vmem:[%s4588_s2] sm:$0x3] }
 0xd8c   :  { %v1255_v29 = vpop.xlane.xlu0 %1254 }
 0xd8d   :  { %3802 = vrsqrt.f32 %v1258_v8  ;;  %v1257_v38 = vmul.f32 0.03125, %v1255_v29 }
 0xd8f   :  { %v1259_v11 = vadd.f32 1e-05, %v1257_v38 }
 0xd91   :  { %3804 = vrsqrt.f32 %v1259_v11  ;;  %v1499_v11 = vrot.slane %v144_v6, %v4013_v23 }
 0xd97   :  { %v3803_v15 = vpop.eup %3802 }
 0xd98   :  { %v1262_v16 = vmul.f32 %v3803_v15, %v4180_v43 }
 0xd9a   :  { %v1268_v10 = vmul.f32 %v1267_v14, %v1262_v16 }
 0xd9b   :  { %v3805_v9 = vpop.eup %3804 }
 0xd9c   :  { %v1263_v21 = vmul.f32 %v3805_v9, %v4178_v42  ;;  %v1274_v25 = vadd.f32 %v1273_v17, %v1268_v10  ;;  %v2984_v9 = vld [vmem:[%s4592_s6 + $0x20] sm:$0xff] }
 0xd9e   :  { %v1269_v26 = vmul.f32 %v1267_v14, %v1263_v21  ;;  %3294 = vmatprep.mubr.msk.f32.mxu0 %vm153_vm1, %v1274_v25  ;;  %v2985_v21 = vld [vmem:[%s4592_s6 + $0x28] sm:$0xff] }
 0xda0   :  { %v1275_v27 = vadd.f32 %v1273_v17, %v1269_v26  ;;  %v3600_v26 = vpack.c.bf16 %v2985_v21, %v2984_v9 }
 0xda2   :  { %3295 = vmatmul.mubr.msk.f32.vlgmr.msra.gmra.mrb[10].mxu0 %vm153_vm1, %v1275_v27 }
 0xda3   :  { %3336 = vmatprep.mubr.msk.f32.mxu0 %vm3869_vm5, %v3870_v36 }
 0xe75   :  { %v3296_v37 = vpop.f32.mrb[10].mxu0 }
 0xe76   :  { %v1362_v40 = vadd.f32 %v3296_v37, %v1283_v34  ;;  %v1356_v42 = vpop.f32.mrb[11].mxu0 }
 0xe77   :  { %v1357_v43 = vadd.f32 %v1356_v42, %v1283_v34  ;;  %v2990_v34 = vld [vmem:[%s4593_s7 + $0x28] sm:$0xff]  ;;  %v2992_v42 = vld [vmem:[%s4593_s7 + $0x38] sm:$0xff] }
 0xe78   :  { %v1366_v19 = vmax.f32 %v1362_v40, 0.0  ;;  %v3605_v37 = vpack.c.bf16 %v2990_v34, %v2989_v32  ;;  %v2991_v40 = vld [vmem:[%s4593_s7 + $0x30] sm:$0xff] }
 0xe79   :  { %v1365_v44 = vmax.f32 %v1357_v43, 0.0  ;;  %v3609_v43 = vpack.c.bf16 %v2992_v42, %v2991_v40 }
 0xe7b   :  { %3329 = vmatprep.mubr.f32.mxu1 %v1365_v44 }
 0xe7c   :  { %3330 = vmatmul.mubr.f32.vlgmr.msra.gmra.mrb[14].mxu1 %v1366_v19 }
 0xe7d   :  { %3379 = vmatprep.mubr.msk.f32.mxu1 %vm3869_vm5, %v3870_v36 }
 0xf4f   :  { %v3331_v45 = vpop.f32.mrb[14].mxu1 }
 0xf50   :  { %v1459_v46 = vadd.f32 %v3331_v45, %v1386_v41  ;;  %v1453_v39 = vpop.f32.mrb[15].mxu1 }
 0xf51   :  { %v1454_v47 = vadd.f32 %v1453_v39, %v1386_v41  ;;  %v4330_v41 = vld [vmem:[%s4597_s11 + $0x10] sm:$0xff] }
 0xf52   :  { %v1463_v48 = vadd.f32 %v1459_v46, %v1275_v27  ;;  %v2986_v27 = vld [vmem:[%s4592_s6 + $0x30] sm:$0xff]  ;;  %v1588_v45 = vrot.slane %v4330_v41, %v4013_v23 }
 0xf53   :  { %v1462_v49 = vadd.f32 %v1454_v47, %v1274_v25  ;;  %v3603_v31 = vpack.c.bf16 %v2987_v30, %v2986_v27 }
 0xf54   :  { %v1467_v50 = vsel %vm153_vm1, %v1463_v48, 0.0 }
 0xf55   :  { %1468 = vadd.xlane.f32.xlu0 %v1467_v50  ;;  %v1464_v51 = vsel %vm153_vm1, %v1462_v49, 0.0 }
 0xf56   :  { %1465 = vadd.xlane.f32.xlu1 %v1464_v51 }
 0xfe2   :  { %v1469_v52 = vpop.xlane.xlu0 %1468 }
 0xfe3   :  { %v1471_v53 = vmul.f32 0.03125, %v1469_v52  ;;  %v1466_v54 = vpop.xlane.xlu1 %1465 }
 0xfe4   :  { %v1470_v55 = vmul.f32 0.03125, %v1466_v54 }
 0xfe5   :  { %v1473_v56 = vsub.f32 %v1463_v48, %v1471_v53  ;;  %v1670_v48 = vrot.slane %v4330_v41, %v241_v28 }
 0xfe6   :  { %v1472_v57 = vsub.f32 %v1462_v49, %v1470_v55 }
 0xfe7   :  { %v1475_v58 = vmul.f32 %v1473_v56, %v1473_v56 }
 0xfe8   :  { %v1474_v59 = vmul.f32 %v1472_v57, %v1472_v57 }
 0xfe9   :  { %v1479_v60 = vsel %vm153_vm1, %v1475_v58, 0.0 }
 0xfea   :  { %1480 = vadd.xlane.f32.xlu0 %v1479_v60  ;;  %v1476_v61 = vsel %vm153_vm1, %v1474_v59, 0.0  ;;  %v4361_v59 = vld [vmem:[%s4590_s4] sm:$0x3]  ;;  %s4610_s4 = smov 8  }
 0xfeb   :  { %1477 = vadd.xlane.f32.xlu1 %v1476_v61 }
0x1077   :  { %v1481_v63 = vpop.xlane.xlu0 %1480 }
0x1078   :  { %v1483_v0 = vmul.f32 0.03125, %v1481_v63  ;;  %v1478_v1 = vpop.xlane.xlu1 %1477 }
0x1079   :  { %v1482_v2 = vmul.f32 0.03125, %v1478_v1 }
0x107a   :  { %v1485_v3 = vadd.f32 1e-05, %v1483_v0 }
0x107b   :  { %v1484_v4 = vadd.f32 1e-05, %v1482_v2 }
0x107c   :  { %3806 = vrsqrt.f32 %v1485_v3 }
0x107d   :  { %3808 = vrsqrt.f32 %v1484_v4 }
0x1086   :  { %v3807_v8 = vpop.eup %3806 }
0x1087   :  { %v3809_v29 = vpop.eup %3808  ;;  %v1489_v38 = vmul.f32 %v3807_v8, %v1473_v56 }
0x1088   :  { %v1488_v14 = vmul.f32 %v3809_v29, %v1472_v57 }
0x1089   :  { %v1495_v15 = vmul.f32 %v1493_v7, %v1489_v38 }
0x108a   :  { %v1494_v16 = vmul.f32 %v1493_v7, %v1488_v14 }
0x108b   :  { %v1501_v17 = vadd.f32 %v1499_v11, %v1495_v15 }
0x108c   :  { %v1500_v10 = vadd.f32 %v1499_v11, %v1494_v16 }
0x108e   :  { %v3597_v25 = vpack.c.bf16 %v1501_v17, %v1500_v10 }
0x1090   :  { %3598 = vmatpush3.bf16.msra.mxu0 %v3597_v25 }
0x1091   :  { %3599 = vmatprep.subr.bf16.mxu0 %v3868_v62 }
0x1093   :  { %3337 = vmatmul.mubr.msk.f32.vlgmr.msra.gmra.mrb[12].mxu0 %vm405_vm3, %v1502_v24 }
0x1094   :  { %3601 = vmatpush3.bf16.msra.mxu0 %v3600_v26  ;;  %3347 = vmatprep.mubr.msk.f32.mxu0 %vm3869_vm5, %v3870_v36 }
0x1095   :  { %3602 = vmatprep.subr.bf16.mxu0 %v3868_v62 }
0x1098   :  { %3604 = vmatpush3.bf16.msra.mxu0 %v3603_v31 }
0x1099   :  { %3606 = vmatprep.subr.bf16.mxu0 %v3605_v37 }
0x1166   :  { %v4318_v44 = vpop.f32.mrb[12].mxu0 }
0x1167   :  { %v3338_v19 = vpop.f32.mrb[13].mxu0  ;;  %3348 = vmatmul.mubr.msk.f32.vlgmr.msra.gmra.mrb[14].mxu0 %vm153_vm1, %v4318_v44 }
0x1168   :  { %3608 = vmatpush3.bf16.msra.mxu0 %v3605_v37  ;;  %3358 = vmatprep.mubr.msk.f32.mxu0 %vm153_vm1, %v1500_v10 }
0x1169   :  { %3610 = vmatprep.subr.bf16.mxu0 %v3609_v43 }
0x116c   :  { %3612 = vmatpush3.bf16.msra.mxu0 %v3609_v43 }
0x116d   :  { %3613 = vmatprep.subr.bf16.mxu0 %v3868_v62 }
0x116f   :  { %3359 = vmatmul.mubr.msk.f32.vlgmr.msra.gmra.mrb[16].mxu0 %vm153_vm1, %v1501_v17 }
0x1170   :  { %3365 = vmatprep.mubr.msk.f32.mxu0 %vm3869_vm5, %v3870_v36 }
0x123a   :  { %v1658_v46 = vpop.f32.mrb[14].mxu0 }
0x123b   :  { %v4334_v39 = vadd.f32 %v1658_v46, %v1588_v45  ;;  %v3349_v47 = vpop.f32.mrb[15].mxu0 }
0x123d   :  { %1922 = vrot.lane.b32.xlu0 %v4334_v39, %s3858_s17 }
0x1242   :  { %v3360_v49 = vpop.f32.mrb[16].mxu0 }
0x1243   :  { %v1749_v50 = vadd.f32 %v3360_v49, %v1670_v48  ;;  %v1743_v51 = vpop.f32.mrb[17].mxu0 }
0x1244   :  { %v1744_v52 = vadd.f32 %v1743_v51, %v1670_v48 }
0x1246   :  { %v4341_v53 = vpack.i.bf16 %v1749_v50, %v1744_v52  ;;  %v3614_v54 = vpack.c.bf16 %v1749_v50, %v1744_v52 }
0x1248   :  { %3736 = vrot.lane.b32.xlu1 %v4341_v53, %s3858_s17  ;;  %3616 = vmatpush3.bf16.xpose.msk.msra.mxu0 %vm4032_vm2, %v3614_v54 }
0x1249   :  { %3617 = vmatprep.subr.bf16.mxu0 %v3868_v62 }
0x124f   :  { %3366 = vmatmul.mubr.msk.f32.vlgmr.msra.gmra.mrb[18].mxu0 %vm59_vm0, %v4334_v39 }
0x1250   :  { %3372 = vmatprep.mubr.msk.f32.mxu0 %vm3869_vm5, %v3870_v36 }
0x12af   :  { %v1923_v58 = vpop.permute.xlu0 %1922 }
0x12ba   :  { %v3737_v28 = vpop.permute.xlu1 %3736 }
0x12bb   :  { %v3739_v55 = vunpack.i.h.bf16 %v3737_v28  ;;  %v3738_v56 = vunpack.i.l.bf16 %v3737_v28 }
0x12bd   :  { %v3621_v57 = vpack.c.bf16 %v3739_v55, %v3738_v56 }
0x12bf   :  { %3623 = vmatpush3.bf16.xpose.msk.msra.mxu1 %vm4032_vm2, %v3621_v57 }
0x12c0   :  { %3631 = vmatprep.subr.bf16.mxu1 %v3868_v62 }
0x12c6   :  { %3380 = vmatmul.mubr.msk.f32.vlgmr.msra.gmra.mrb[16].mxu1 %vm59_vm0, %v1923_v58 }
0x12c7   :  { %3400 = vmatprep.mubr.msk.f32.mxu1 %vm3869_vm5, %v3870_v36 }
0x1322   :  { %v1827_v60 = vpop.f32.mrb[18].mxu0 }
0x1323   :  { %v1828_v61 = vadd.f32 %v1827_v60, %v4361_v59  ;;  %v3367_v63 = vpop.f32.mrb[19].mxu0 }
0x1325   :  { %v1832_v0 = vsel %vm1831_vm6, %v1828_v61, -inf }
0x1326   :  { %1833 = vmax.xlane.f32.xlu1 %v1832_v0 }
0x1337   :  { %3741 = vrot.lane.b32.xlu1 %v4341_v53, %s3859_s22 }
0x1399   :  { %v2000_v1 = vpop.f32.mrb[16].mxu1 }
0x139a   :  { %v2001_v2 = vadd.f32 %v2000_v1, %v4361_v59  ;;  %v3381_v3 = vpop.f32.mrb[17].mxu1 }
0x139c   :  { %v2004_v4 = vsel %vm1831_vm6, %v2001_v2, -inf }
0x139d   :  { %2005 = vmax.xlane.f32.xlu0 %v2004_v4 }
0x13b3   :  { %v1834_v6 = vpop.xlane.xlu1 %1833 }
0x13b4   :  { %v1835_v7 = vsub.f32 %v1828_v61, %v1834_v6 }
0x13b6   :  { %v1836_v8 = vmul.f32 1.442695, %v1835_v7 }
0x13b7   :  { %v3742_v29 = vpop.permute.xlu1 %3741 }
0x13b8   :  { %3810 = vpow2.f32 %v1836_v8  ;;  %v3744_v38 = vunpack.i.h.bf16 %v3742_v29  ;;  %v3743_v11 = vunpack.i.l.bf16 %v3742_v29 }
0x13ba   :  { %v3618_v14 = vpack.c.bf16 %v3744_v38, %v3743_v11 }
0x13bc   :  { %3619 = vmatpush3.bf16.msra.mxu0 %v3618_v14 }
0x13bd   :  { %3624 = vmatprep.subr.bf16.mxu0 %v3868_v62 }
0x13c2   :  { %v3811_v15 = vpop.eup %3810 }
0x13c3   :  { %v1838_v16 = vsel %vm1831_vm6, %v3811_v15, 0.0 }
0x13c4   :  { %1839 = vadd.xlane.f32.xlu1 %v1838_v16 }
0x13d5   :  { %3751 = vrot.lane.b32.xlu1 %v4341_v53, %s3860_s3 }
0x13d9   :  { %2094 = vrot.lane.b32.xlu1 %v4334_v39, %s3860_s3 }
0x142a   :  { %v2006_v17 = vpop.xlane.xlu0 %2005 }
0x142b   :  { %v2007_v10 = vsub.f32 %v2001_v2, %v2006_v17 }
0x142d   :  { %v2008_v9 = vmul.f32 1.442695, %v2007_v10 }
0x142f   :  { %3812 = vpow2.f32 %v2008_v9 }
0x1439   :  { %v3813_v21 = vpop.eup %3812 }
0x143a   :  { %v2010_v25 = vsel %vm1831_vm6, %v3813_v21, 0.0 }
0x143b   :  { %2011 = vadd.xlane.f32.xlu0 %v2010_v25 }
0x1451   :  { %3746 = vrot.lane.b32.xlu0 %v4341_v53, %s3861_s23  ;;  %v1840_v24 = vpop.xlane.xlu1 %1839 }
0x1452   :  { %3814 = vrcp.f32 %v1840_v24 }
0x1455   :  { %v3752_v40 = vpop.permute.xlu1 %3751 }
0x1456   :  { %v3754_v43 = vunpack.i.h.bf16 %v3752_v40  ;;  %v3753_v19 = vunpack.i.l.bf16 %v3752_v40  ;;  %v3013_v40 = vld [vmem:[%s4594_s8 + $0x30] sm:$0xff] }
0x1458   :  { %v3628_v46 = vpack.c.bf16 %v3754_v43, %v3753_v19  ;;  %v3014_v43 = vld [vmem:[%s4594_s8 + $0x38] sm:$0xff] }
0x1459   :  { %v2095_v47 = vpop.permute.xlu1 %2094  ;;  %v3645_v19 = vpack.c.bf16 %v3014_v43, %v3013_v40 }
0x145c   :  { %v3815_v26 = vpop.eup %3814 }
0x145d   :  { %v1842_v27 = vmul.f32 %v3815_v26, %v3811_v15 }
0x145f   :  { %3373 = vmatmul.mubr.msk.f32.vlgmr.msra.gmra.mrb[20].mxu0 %vm405_vm3, %v1842_v27 }
0x1460   :  { %3386 = vmatprep.mubr.msk.f32.mxu0 %vm3869_vm5, %v3870_v36 }
0x14c8   :  { %v2012_v30 = vpop.xlane.xlu0 %2011 }
0x14c9   :  { %3816 = vrcp.f32 %v2012_v30 }
0x14cc   :  { %v3747_v31 = vpop.permute.xlu0 %3746 }
0x14cd   :  { %v3749_v32 = vunpack.i.h.bf16 %v3747_v31  ;;  %v3748_v34 = vunpack.i.l.bf16 %v3747_v31 }
0x14cf   :  { %v3625_v37 = vpack.c.bf16 %v3749_v32, %v3748_v34  ;;  %v3011_v34 = vld [vmem:[%s4594_s8 + $0x20] sm:$0xff] }
0x14d1   :  { %3626 = vmatpush3.bf16.msra.mxu0 %v3625_v37  ;;  %v3012_v37 = vld [vmem:[%s4594_s8 + $0x28] sm:$0xff] }
0x14d2   :  { %3627 = vmatprep.subr.bf16.mxu0 %v3868_v62 }
0x14d3   :  { %v3817_v42 = vpop.eup %3816 }
0x14d4   :  { %v2014_v45 = vmul.f32 %v3817_v42, %v3813_v21  ;;  %v3642_v42 = vpack.c.bf16 %v3012_v37, %v3011_v34  ;;  %v2553_v37 = vrot.slane %v4330_v41, %v1266_v12  ;;  %v3036_v12 = vld [vmem:[%s4596_s10 + $0xf8] sm:$0xff] }
0x14d6   :  { %3387 = vmatmul.mubr.msk.f32.vlgmr.msra.gmra.mrb[22].mxu0 %vm405_vm3, %v2014_v45 }
0x14d7   :  { %3393 = vmatprep.mubr.msk.f32.mxu0 %vm3869_vm5, %v3870_v36 }
0x14da   :  { %3630 = vmatpush3.bf16.xpose.msk.msra.mxu0 %vm4032_vm2, %v3628_v46 }
0x14db   :  { %3638 = vmatprep.subr.bf16.mxu0 %v3868_v62 }
0x14e1   :  { %3394 = vmatmul.mubr.msk.f32.vlgmr.msra.gmra.mrb[24].mxu0 %vm59_vm0, %v2095_v47 }
0x14e2   :  { %3414 = vmatprep.mubr.msk.f32.mxu0 %vm3869_vm5, %v3870_v36 }
0x1532   :  { %v4391_v48 = vpop.f32.mrb[20].mxu0 }
0x1533   :  { %v3374_v49 = vpop.f32.mrb[21].mxu0 }
0x15a9   :  { %v2090_v50 = vpop.f32.mrb[22].mxu0 }
0x15aa   :  { %v3388_v51 = vpop.f32.mrb[23].mxu0 }
0x15b4   :  { %v2172_v52 = vpop.f32.mrb[24].mxu0 }
0x15b5   :  { %v2173_v54 = vadd.f32 %v2172_v52, %v4361_v59  ;;  %v3395_v28 = vpop.f32.mrb[25].mxu0 }
0x15b6   :  { %v2461_v28 = vrot.slane %v4330_v41, %v1152_v20  ;;  %v3016_v20 = vld [vmem:[%s4595_s9 + $0x20] sm:$0xff] }
0x15b7   :  { %v2176_v55 = vsel %vm1831_vm6, %v2173_v54, -inf }
0x15b8   :  { %2177 = vmax.xlane.f32.xlu1 %v2176_v55 }
0x15c9   :  { %3761 = vrot.lane.b32.xlu1 %v4341_v53, %s3862_s24 }
0x15cd   :  { %2266 = vrot.lane.b32.xlu1 %v4334_v39, %s3862_s24 }
0x1645   :  { %v2178_v56 = vpop.xlane.xlu1 %2177 }
0x1646   :  { %v2179_v57 = vsub.f32 %v2173_v54, %v2178_v56 }
0x1648   :  { %v2180_v58 = vmul.f32 1.442695, %v2179_v57 }
0x1649   :  { %v3762_v4 = vpop.permute.xlu1 %3761 }
0x164a   :  { %3818 = vpow2.f32 %v2180_v58  ;;  %v3764_v6 = vunpack.i.h.bf16 %v3762_v4  ;;  %v3763_v7 = vunpack.i.l.bf16 %v3762_v4  ;;  %v3019_v4 = vld [vmem:[%s4595_s9 + $0x38] sm:$0xff] }
0x164c   :  { %v3635_v29 = vpack.c.bf16 %v3764_v6, %v3763_v7  ;;  %v3021_v6 = vld [vmem:[%s4596_s10 + $0x80] sm:$0xff]  ;;  %v3022_v7 = vld [vmem:[%s4596_s10 + $0x88] sm:$0xff] }
0x164d   :  { %v2267_v38 = vpop.permute.xlu1 %2266 }
0x1654   :  { %v3819_v60 = vpop.eup %3818 }
0x1655   :  { %v2182_v61 = vsel %vm1831_vm6, %v3819_v60, 0.0 }
0x1656   :  { %2183 = vadd.xlane.f32.xlu0 %v2182_v61 }
0x166c   :  { %3756 = vrot.lane.b32.xlu0 %v4341_v53, %s3863_s25 }
0x16e3   :  { %v2184_v63 = vpop.xlane.xlu0 %2183 }
0x16e4   :  { %3820 = vrcp.f32 %v2184_v63 }
0x16e7   :  { %v3757_v0 = vpop.permute.xlu0 %3756 }
0x16e8   :  { %v3759_v1 = vunpack.i.h.bf16 %v3757_v0  ;;  %v3758_v2 = vunpack.i.l.bf16 %v3757_v0 }
0x16ea   :  { %v3632_v3 = vpack.c.bf16 %v3759_v1, %v3758_v2  ;;  %v3017_v2 = vld [vmem:[%s4595_s9 + $0x28] sm:$0xff] }
0x16ec   :  { %3633 = vmatpush3.bf16.msra.mxu1 %v3632_v3  ;;  %v3648_v3 = vpack.c.bf16 %v3017_v2, %v3016_v20  ;;  %v2760_v20 = vld [vmem:[%s4598_s12 + $0x10] sm:$0xff]  ;;  %v2761_v2 = vld [vmem:[%s4598_s12 + $0x18] sm:$0xff] }
0x16ed   :  { %3634 = vmatprep.subr.bf16.mxu1 %v3868_v62 }
0x16ee   :  { %v3821_v39 = vpop.eup %3820 }
0x16ef   :  { %v2186_v8 = vmul.f32 %v3821_v39, %v3819_v60 }
0x16f1   :  { %3401 = vmatmul.mubr.msk.f32.vlgmr.msra.gmra.mrb[18].mxu1 %vm405_vm3, %v2186_v8  ;;  %v3023_v8 = vld [vmem:[%s4596_s10 + $0x90] sm:$0xff] }
0x16f2   :  { %3407 = vmatprep.mubr.msk.f32.mxu1 %vm3869_vm5, %v3870_v36 }
0x16f5   :  { %3637 = vmatpush3.bf16.xpose.msk.msra.mxu1 %vm4032_vm2, %v3635_v29  ;;  %v3654_v29 = vpack.c.bf16 %v3022_v7, %v3021_v6  ;;  %v2983_v6 = vld [vmem:[%s4597_s11 + $0x18] sm:$0xff]  ;;  %v2751_v7 = vrot.slane %v4330_v41, %v1492_v5 }
0x16f6   :  { %3647 = vmatprep.subr.bf16.mxu1 %v3868_v62 }
0x16fc   :  { %3408 = vmatmul.mubr.msk.f32.vlgmr.msra.gmra.mrb[20].mxu1 %vm59_vm0, %v2267_v38  ;;  %v3024_v38 = vld [vmem:[%s4596_s10 + $0x98] sm:$0xff] }
0x16fd   :  { %3436 = vmatprep.mubr.msk.f32.mxu1 %vm3869_vm5, %v3870_v36  ;;  %3649 = vmatpush3.bf16.msra.mxu1 %v3648_v3  ;;  %v3681_v3 = vpack.c.bf16 %v2761_v2, %v2760_v20 }
0x16fe   :  { %3650 = vmatprep.subr.bf16.mxu1 %v3868_v62 }
0x17c4   :  { %v2262_v11 = vpop.f32.mrb[18].mxu1 }
0x17c5   :  { %v3402_v14 = vpop.f32.mrb[19].mxu1 }
0x17c6   :  { %v3025_v14 = vld [vmem:[%s4596_s10 + $0xa0] sm:$0xff] }
0x17cf   :  { %v2344_v15 = vpop.f32.mrb[20].mxu1 }
0x17d0   :  { %v2345_v16 = vadd.f32 %v2344_v15, %v4361_v59  ;;  %v3409_v17 = vpop.f32.mrb[21].mxu1  ;;  %v3026_v15 = vld [vmem:[%s4596_s10 + $0xa8] sm:$0xff] }
0x17d1   :  { %v3027_v17 = vld [vmem:[%s4596_s10 + $0xb0] sm:$0xff] }
0x17d2   :  { %v2348_v10 = vsel %vm1831_vm6, %v2345_v16, -inf }
0x17d3   :  { %2349 = vmax.xlane.f32.xlu0 %v2348_v10  ;;  %v3028_v10 = vld [vmem:[%s4596_s10 + $0xb8] sm:$0xff] }
0x17e9   :  { %3766 = vrot.lane.b32.xlu0 %v4341_v53, %s3866_s28 }
0x17ed   :  { %2443 = vrot.lane.b32.xlu0 %v2262_v11, %s3865_s27  ;;  %v3657_v11 = vpack.c.bf16 %v3024_v38, %v3023_v8  ;;  %v2756_v38 = vrot.slane %v2983_v6, %v4013_v23  ;;  %v3037_v23 = vld [vmem:[%s4599_s13] ss:$0 sm:$0xff] }
0x1860   :  { %v2350_v35 = vpop.xlane.xlu0 %2349 }
0x1861   :  { %v2351_v9 = vsub.f32 %v2345_v16, %v2350_v35  ;;  %v3660_v16 = vpack.c.bf16 %v3026_v15, %v3025_v14  ;;  %v3663_v35 = vpack.c.bf16 %v3028_v10, %v3027_v17 }
0x1863   :  { %v2352_v21 = vmul.f32 1.442695, %v2351_v9  ;;  %v3029_v9 = vld [vmem:[%s4596_s10 + $0xc0] sm:$0xff] }
0x1864   :  { %v3767_v25 = vpop.permute.xlu0 %3766 }
0x1865   :  { %3822 = vpow2.f32 %v2352_v21  ;;  %v3769_v24 = vunpack.i.h.bf16 %v3767_v25  ;;  %v3768_v26 = vunpack.i.l.bf16 %v3767_v25  ;;  %v3030_v21 = vld [vmem:[%s4596_s10 + $0xc8] sm:$0xff] }
0x1866   :  { %v3666_v25 = vpack.c.bf16 %v3030_v21, %v3029_v9 }
0x1867   :  { %v3639_v27 = vpack.c.bf16 %v3769_v24, %v3768_v26  ;;  %v3031_v24 = vld [vmem:[%s4596_s10 + $0xd0] sm:$0xff]  ;;  %v3032_v26 = vld [vmem:[%s4596_s10 + $0xd8] sm:$0xff] }
0x1869   :  { %3640 = vmatpush3.bf16.msra.mxu0 %v3639_v27  ;;  %v3669_v27 = vpack.c.bf16 %v3032_v26, %v3031_v24 }
0x186a   :  { %3641 = vmatprep.subr.bf16.mxu0 %v3868_v62 }
0x186f   :  { %v3823_v59 = vpop.eup %3822 }
0x1870   :  { %v2354_v30 = vsel %vm1831_vm6, %v3823_v59, 0.0 }
0x1871   :  { %2355 = vadd.xlane.f32.xlu1 %v2354_v30  ;;  %v3034_v30 = vld [vmem:[%s4596_s10 + $0xe8] sm:$0xff] }
0x1882   :  { %2439 = vrot.lane.b32.xlu1 %v2090_v50, %s4610_s4  ;;  %v2444_v50 = vpop.permute.xlu0 %2443 }
0x18fe   :  { %v2356_v53 = vpop.xlane.xlu1 %2355 }
0x18ff   :  { %3824 = vrcp.f32 %v2356_v53 }
0x1902   :  { %v2440_v47 = vpop.permute.xlu1 %2439 }
0x1903   :  { %v2450_v49 = vsel %vm59_vm0, %v4391_v48, %v2440_v47 }
0x1904   :  { %v2451_v51 = vsel %vm405_vm3, %v2450_v49, %v2444_v50 }
0x1909   :  { %v3825_v31 = vpop.eup %3824 }
0x190a   :  { %v2358_v32 = vmul.f32 %v3825_v31, %v3823_v59  ;;  %v3033_v59 = vld [vmem:[%s4596_s10 + $0xe0] sm:$0xff] }
0x190b   :  { %v3672_v53 = vpack.c.bf16 %v3034_v30, %v3033_v59 }
0x190c   :  { %3415 = vmatmul.mubr.msk.f32.vlgmr.msra.gmra.mrb[26].mxu0 %vm405_vm3, %v2358_v32 }
0x190d   :  { %3425 = vmatprep.mubr.msk.f32.mxu0 %vm3869_vm5, %v3870_v36  ;;  %3643 = vmatpush3.bf16.msra.mxu0 %v3642_v42  ;;  %v2558_v42 = vrot.slane %v4330_v41, %v1272_v13  ;;  %v2568_v13 = vrot.slane %v4330_v41, %v1282_v33 }
0x190e   :  { %3644 = vmatprep.subr.bf16.mxu0 %v3868_v62 }
0x1911   :  { %3646 = vmatpush3.bf16.msra.mxu0 %v3645_v19 }
0x1912   :  { %3653 = vmatprep.subr.bf16.mxu0 %v3868_v62 }
0x19df   :  { %v2434_v45 = vpop.f32.mrb[26].mxu0 }
0x19e0   :  { %2447 = vrot.lane.b32.xlu1 %v2434_v45, %s4611_s21  ;;  %v3416_v46 = vpop.f32.mrb[27].mxu0 }
0x19e1   :  { %v3035_v46 = vld [vmem:[%s4596_s10 + $0xf0] sm:$0xff] }
0x19e2   :  { %v3675_v47 = vpack.c.bf16 %v3036_v12, %v3035_v46 }
0x1a52   :  { %v2448_v52 = vpop.permute.xlu1 %2447 }
0x1a53   :  { %v2452_v54 = vsel %vm1143_vm4, %v2451_v51, %v2448_v52 }
0x1a54   :  { %3426 = vmatmul.mubr.msk.f32.vlgmr.msra.gmra.mrb[28].mxu0 %vm153_vm1, %v2452_v54  ;;  %v2663_v54 = vrot.slane %v4330_v41, %v1385_v18  ;;  %v2759_v18 = vld [vmem:[%s4598_s12 + $0x8] sm:$0xff] }
0x1a55   :  { %3471 = vmatprep.mubr.msk.f32.mxu0 %vm3869_vm5, %v3870_v36  ;;  %3655 = vmatpush3.bf16.msra.mxu0 %v3654_v29 }
0x1a56   :  { %3656 = vmatprep.subr.bf16.mxu0 %v3868_v62 }
0x1a59   :  { %3658 = vmatpush3.bf16.msra.mxu0 %v3657_v11 }
0x1a5a   :  { %3659 = vmatprep.subr.bf16.mxu0 %v3868_v62 }
0x1a5d   :  { %3661 = vmatpush3.bf16.msra.mxu0 %v3660_v16 }
0x1a5e   :  { %3662 = vmatprep.subr.bf16.mxu0 %v3868_v62 }
0x1a61   :  { %3664 = vmatpush3.bf16.msra.mxu0 %v3663_v35 }
0x1a62   :  { %3665 = vmatprep.subr.bf16.mxu0 %v3868_v62 }
0x1a65   :  { %3667 = vmatpush3.bf16.msra.mxu0 %v3666_v25 }
0x1a66   :  { %3668 = vmatprep.subr.bf16.mxu0 %v3868_v62 }
0x1a69   :  { %3670 = vmatpush3.bf16.msra.mxu0 %v3669_v27 }
0x1a6a   :  { %3671 = vmatprep.subr.bf16.mxu0 %v3868_v62 }
0x1a6d   :  { %3673 = vmatpush3.bf16.msra.mxu0 %v3672_v53 }
0x1a6e   :  { %3674 = vmatprep.subr.bf16.mxu0 %v3868_v62 }
0x1a71   :  { %3676 = vmatpush3.bf16.msra.mxu0 %v3675_v47 }
0x1b27   :  { %v2531_v55 = vpop.f32.mrb[28].mxu0 }
0x1b28   :  { %v2532_v56 = vadd.f32 %v2531_v55, %v2461_v28  ;;  %v3427_v57 = vpop.f32.mrb[29].mxu0 }
0x1b2a   :  { %v2535_v48 = vadd.f32 %v2532_v56, %v4318_v44  ;;  %v3018_v44 = vld [vmem:[%s4595_s9 + $0x30] sm:$0xff] }
0x1b2b   :  { %v3651_v39 = vpack.c.bf16 %v3019_v4, %v3018_v44 }
0x1b2c   :  { %v2537_v58 = vsel %vm2536_vm7, %v2535_v48, 0.0 }
0x1b2d   :  { %2538 = vadd.xlane.f32.xlu0 %v2537_v58  ;;  %3652 = vmatpush3.bf16.msra.mxu1 %v3651_v39 }
0x1b2e   :  { %3677 = vmatprep.subr.bf16.mxu1 %v3868_v62 }
0x1bba   :  { %v2539_v60 = vpop.xlane.xlu0 %2538 }
0x1bbb   :  { %v2540_v61 = vmul.f32 0.03125, %v2539_v60 }
0x1bbd   :  { %v2541_v63 = vsub.f32 %v2535_v48, %v2540_v61 }
0x1bbf   :  { %v2542_v0 = vmul.f32 %v2541_v63, %v2541_v63 }
0x1bc1   :  { %v2543_v1 = vsel %vm2536_vm7, %v2542_v0, 0.0  ;;  %v2758_v0 = vld [vmem:[%s4598_s12] sm:$0xff] }
0x1bc2   :  { %2544 = vadd.xlane.f32.xlu1 %v2543_v1  ;;  %v3678_v1 = vpack.c.bf16 %v2759_v18, %v2758_v0 }
0x1c4f   :  { %v2545_v31 = vpop.xlane.xlu1 %2544 }
0x1c50   :  { %v2546_v32 = vmul.f32 0.03125, %v2545_v31 }
0x1c52   :  { %v2547_v34 = vadd.f32 1e-05, %v2546_v32 }
0x1c54   :  { %3826 = vrsqrt.f32 %v2547_v34 }
0x1c5e   :  { %v3827_v40 = vpop.eup %3826 }
0x1c5f   :  { %v2549_v43 = vmul.f32 %v3827_v40, %v2541_v63 }
0x1c61   :  { %v2554_v19 = vmul.f32 %v2553_v37, %v2549_v43 }
0x1c63   :  { %v2559_v45 = vadd.f32 %v2558_v42, %v2554_v19 }
0x1c65   :  { %3437 = vmatmul.mubr.msk.f32.vlgmr.msra.gmra.mrb[22].mxu1 %vm153_vm1, %v2559_v45 }
0x1c66   :  { %3482 = vmatprep.mubr.msk.f32.mxu1 %vm3869_vm5, %v3870_v36  ;;  %3679 = vmatpush3.bf16.msra.mxu1 %v3678_v1 }
0x1c67   :  { %3680 = vmatprep.subr.bf16.mxu1 %v3868_v62 }
0x1c6a   :  { %3682 = vmatpush3.bf16.msra.mxu1 %v3681_v3 }
0x1c6b   :  { %3683 = vmatprep.subr.bf16.mxu1 %v3868_v62  ;;  %v2843_v62 = vld [vmem:[%s4600_s14] sm:$0xff]  ;;  %s3871_s14 = smov [#allocation2]  }
0x1c6c   :  { %v3684_v5 = vpack.c.bf16 %v2844_v22, %v2843_v62  ;;  %s2939_s13 = sshll.u32 %s3871_s14, 4  ;;  %s2940_s13 = int_to_ptr.vmem [resolvable:$true] %s2939_s13 }
0x1c6d   :  { %s3834_s19 = scalar_lea.vmem %s2940_s13, 32  ;;  %p3839_p1 = scmp.lt.s32.totalorder %s2940_s13, %s2940_s13 }
0x1c6e   :  { %p3835_p0 = scmp.ne.s32.totalorder %s2940_s13, %s3834_s19  ;;  %p3840_p2 = scmp.lt.s32.totalorder %s3834_s19, %s3834_s19 }
0x1c70   :  { %p3841_p3 = por %p3840_p2, %p3839_p1 }
0x1c72   :  { %p3842_p4 = pnand %p3841_p3, %p3835_p0 }
0x1d38   :  { %v2638_v49 = vpop.f32.mrb[22].mxu1 }
0x1d39   :  { %v2639_v50 = vadd.f32 %v2638_v49, %v2568_v13  ;;  %v3438_v51 = vpop.f32.mrb[23].mxu1 }
0x1d3b   :  { %v2642_v52 = vmax.f32 %v2639_v50, 0.0 }
0x1d3d   :  { %3472 = vmatmul.mubr.f32.vlgmr.msra.gmra.mrb[30].mxu0 %v2642_v52 }
0x1e10   :  { %v2730_v28 = vpop.f32.mrb[30].mxu0 }
0x1e11   :  { %v2731_v55 = vadd.f32 %v2730_v28, %v2663_v54  ;;  %v3473_v56 = vpop.f32.mrb[31].mxu0 }
0x1e13   :  { %v2734_v57 = vadd.f32 %v2731_v55, %v2559_v45 }
0x1e15   :  { %v2735_v48 = vsel %vm2536_vm7, %v2734_v57, 0.0 }
0x1e16   :  { %2736 = vadd.xlane.f32.xlu0 %v2735_v48 }
0x1ea3   :  { %v2737_v58 = vpop.xlane.xlu0 %2736 }
0x1ea4   :  { %v2738_v60 = vmul.f32 0.03125, %v2737_v58 }
0x1ea6   :  { %v2739_v61 = vsub.f32 %v2734_v57, %v2738_v60 }
0x1ea8   :  { %v2740_v33 = vmul.f32 %v2739_v61, %v2739_v61 }
0x1eaa   :  { %v2741_v63 = vsel %vm2536_vm7, %v2740_v33, 0.0 }
0x1eab   :  { %2742 = vadd.xlane.f32.xlu0 %v2741_v63 }
0x1f38   :  { %v2743_v44 = vpop.xlane.xlu0 %2742 }
0x1f39   :  { %v2744_v4 = vmul.f32 0.03125, %v2743_v44 }
0x1f3b   :  { %v2745_v39 = vadd.f32 1e-05, %v2744_v4 }
0x1f3d   :  { %3828 = vrsqrt.f32 %v2745_v39 }
0x1f47   :  { %v3829_v8 = vpop.eup %3828 }
0x1f48   :  { %v2747_v29 = vmul.f32 %v3829_v8, %v2739_v61 }
0x1f4a   :  { %v2752_v11 = vmul.f32 %v2751_v7, %v2747_v29 }
0x1f4c   :  { %v2757_v14 = vadd.f32 %v2756_v38, %v2752_v11 }
0x1f4e   :  { %3483 = vmatmul.mubr.msk.f32.vlgmr.msra.gmra.mrb[24].mxu1 %vm153_vm1, %v2757_v14 }
0x1f4f   :  { %3489 = vmatprep.mubr.msk.f32.mxu1 %vm3869_vm5, %v3870_v36  ;;  %3685 = vmatpush3.bf16.msra.mxu1 %v3684_v5  ;;  %v3039_v36 = vld [vmem:[%s4601_s15] ss:$0 sm:$0xff] }
0x2021   :  { %v2838_v41 = vpop.f32.mrb[24].mxu1 }
0x2022   :  { %v2839_v15 = vadd.f32 %v3037_v23, %v2838_v41  ;;  %v3484_v16 = vpop.f32.mrb[25].mxu1 }
0x2024   :  { %v2842_v17 = vmax.f32 %v2839_v15, 0.0 }
0x2026   :  { %3490 = vmatmul.mubr.msk.f32.vlgmr.msra.gmra.mrb[26].mxu1 %vm405_vm3, %v2842_v17 }
0x20f9   :  { %v2921_v10 = vpop.f32.mrb[26].mxu1 }
0x20fa   :  { %v2922_v35 = vadd.f32 %v3039_v36, %v2921_v10  ;;  %v3491_v9 = vpop.f32.mrb[27].mxu1 }
0x20fc   :  { %v3041_v21 = vmul.f32 -1.442695, %v2922_v35 }
0x20fe   :  { %3830 = vpow2.f32 %v3041_v21 }
0x2108   :  { %v3831_v25 = vpop.eup %3830 }
0x2109   :  { %v2928_v24 = vadd.f32 1.0, %v3831_v25 }
0x210b   :  { %3832 = vrcp.f32 %v2928_v24 }
0x2115   :  { %v3833_v26 = vpop.eup %3832 }
0x2116   :  { %2932 = vst.msk [vmem:[#allocation2] sm:$0x3] %vm2931_vm8, %v3833_v26 }
0x2117   :  { %3845 = shalt.err (!%p3842_p4)
}
0x2118   :  { %s3846_s7 = scalar_lea.hbm %s4602_s16, 32 }
0x2119   :  { %p3847_p5 = scmp.ne.s32.totalorder %s4602_s16, %s3846_s7  ;;  %p3850_p6 = scmp.lt.u32.totalorder %s3846_s7, %s4602_s16 }
0x211b   :  { %p3852_p7 = pnand %p3850_p6, %p3847_p5 }
0x211d   :  { %3855 = shalt.err (!%p3852_p7)
}
0x211e   :  { %2942 = dma.vmem_to_hbm [thread:$0]  %s2940_s13, 32, %s4602_s16, [#allocation3]  }
0x211f   :  { %3856 = dma.done.wait [#allocation3], 32  }
0x2120   :  { %3857 = vsyncadd [#allocation3], 4294967264 }
0x2121   :  { %2946 = vsyncpa [#allocation3], 1 }

</bundles_post_ra>
